<compile_context>
chip_gen: v7x
topology: tpu7x:2x2x1
jax: 0.10.0
libtpu: 0.0.40
codegen_flags: <defaults>
</compile_context>

<pallas_src>
import jax
import jax.numpy as jnp
from jax.experimental import pallas as pl
from jax.experimental.pallas import tpu as pltpu


def product(xs):
    out = 1
    for v in xs:
        out *= v
    return out


# ----------------------------------------------------------------------------
# Hardware queries (robust fallbacks: assume the smallest VMEM / a single TC).
# ----------------------------------------------------------------------------
def _tpu_info():
    try:
        return pltpu.get_tpu_info()
    except Exception:
        return None


def _vmem_capacity_bytes():
    info = _tpu_info()
    for name in ("vmem_capacity_bytes", "vmem_size_bytes", "vmem_bytes"):
        try:
            v = int(getattr(info, name))
        except Exception:
            continue
        if v > 0:
            return v
    return 64 << 20          # conservative: v7x per-TensorCore VMEM


def _num_tensorcores():
    info = _tpu_info()
    for name in ("num_cores", "core_count", "num_tensorcores", "tensorcore_count"):
        try:
            v = int(getattr(info, name))
        except Exception:
            continue
        if v > 0:
            return v
    return 1                 # conservative: skip the megacore split on unknown parts


# ----------------------------------------------------------------------------
# Pallas kernels: one (tm, K) x (K, tn) MXU pass per grid step, split-bf16 feed.
# ----------------------------------------------------------------------------
def _tt_matmul_kernel_split_x(x_ref, w_hi_ref, w_lo_ref, o_ref):
    # x is f32: split into bf16 hi/lo so every MXU pass runs at bf16 rate while the
    # result stays ~f32-accurate:  y ~ x_hi@W_hi + x_lo@W_hi + x_hi@W_lo  (f32 acc).
    x = x_ref[...].astype(jnp.float32)
    x_hi = x.astype(jnp.bfloat16)
    x_lo = (x - x_hi.astype(jnp.float32)).astype(jnp.bfloat16)
    w_hi = w_hi_ref[...]
    acc = jnp.dot(x_hi, w_hi, preferred_element_type=jnp.float32)
    acc = acc + jnp.dot(x_lo, w_hi, preferred_element_type=jnp.float32)
    acc = acc + jnp.dot(x_hi, w_lo_ref[...], preferred_element_type=jnp.float32)
    o_ref[...] = acc.astype(o_ref.dtype)


def _tt_matmul_kernel_bf16_x(x_ref, w_hi_ref, w_lo_ref, o_ref):
    # x already bf16: its low bits are gone, so the x_lo pass would be wasted work.
    x = x_ref[...]
    acc = jnp.dot(x, w_hi_ref[...], preferred_element_type=jnp.float32)
    acc = acc + jnp.dot(x, w_lo_ref[...], preferred_element_type=jnp.float32)
    o_ref[...] = acc.astype(o_ref.dtype)


# ----------------------------------------------------------------------------
# Tiling: W tile (K, tn) resident (tn == N) or streamed over N; x/out tiles = tm rows.
# ----------------------------------------------------------------------------
def _choose_tiling(M, K, N, x_bytes, out_bytes, budget_bytes, num_cores):
    headroom = 4 << 20

    def tm_cap_for(tn):
        w_cost = 2 * K * tn * (2 + 2)                 # 2 pipeline buffers x (bf16 hi + bf16 lo)
        per_row = 2 * (K * x_bytes + tn * out_bytes)  # double-buffered x row + out row
        avail = budget_bytes - headroom - w_cost
        return avail // per_row if avail > 0 else 0

    # Candidate W tile widths: multiples of 512 that divide N (lane-dense stores,
    # MXU-native tiles on v5e/v6e/v7x).  Prefer full N (W fetched exactly once).
    mult = N // 512
    candidates = [512 * d for d in range(mult, 0, -1) if mult % d == 0]
    tn = None
    for c in candidates:                               # widest tile leaving room for >=256 rows
        if tm_cap_for(c) >= min(M, 256):
            tn = c
            break
    if tn is None:
        for c in candidates:                           # otherwise widest tile leaving >=8 rows
            if tm_cap_for(c) >= 8:
                tn = c
                break
    if tn is None:
        tn = 512

    tm_cap = int(max(8, min(2048, tm_cap_for(tn))))
    if M <= tm_cap:
        tm = M                                         # single block covering all rows
        if num_cores >= 2 and M >= 16:
            # 2-TC megacore (v7x): expose at least two parallel M steps.
            tm = ((M + 1) // 2 + 7) // 8 * 8
    else:
        tm = max(8, (tm_cap // 8) * 8)
    return tm, tn


def pallas_tt_projection_matmul(x2, w_hi, w_lo):
    """(M, K) @ (K, N) with W cached as a split bf16 pair (hi, lo)."""
    M, K = x2.shape
    K2, N = w_hi.shape
    assert K == K2 and w_lo.shape == w_hi.shape

    x_bytes = jnp.dtype(x2.dtype).itemsize
    out_dtype = x2.dtype
    out_bytes = jnp.dtype(out_dtype).itemsize

    cap = _vmem_capacity_bytes()
    budget = int(cap * 0.8)                 # per-generation budget with compiler headroom
    cores = _num_tensorcores()

    tm, tn = _choose_tiling(M, K, N, x_bytes, out_bytes, budget, cores)
    grid_m = pl.cdiv(M, tm)
    grid_n = N // tn

    kernel = (_tt_matmul_kernel_bf16_x if x2.dtype == jnp.bfloat16
              else _tt_matmul_kernel_split_x)

    # Count BOTH pipeline buffers of every operand (Pallas double-buffers by default).
    needed = (2 * K * tn * (2 + 2)          # W_hi + W_lo tiles, bf16 each
              + 2 * tm * K * x_bytes        # x tile
              + 2 * tm * tn * out_bytes     # out tile
              + (4 << 20))                  # scratch / semaphore headroom
    vmem_limit = int(min(max(needed, 32 << 20), int(cap * 0.98)))

    n_passes = 2 if x2.dtype == jnp.bfloat16 else 3
    w_reads = 1 if grid_n == 1 else grid_m  # W re-read once per M pass only when N-tiled
    cost = pl.CostEstimate(
        flops=n_passes * 2 * M * K * N,
        transcendentals=0,
        bytes_accessed=(M * K * x_bytes + w_reads * K * N * 4 + M * N * out_bytes),
    )

    return pl.pallas_call(
        kernel,
        out_shape=jax.ShapeDtypeStruct((M, N), out_dtype),
        grid_spec=pltpu.PrefetchScalarGridSpec(
            num_scalar_prefetch=0,
            grid=(grid_m, grid_n),
            in_specs=[
                pl.BlockSpec((tm, K), lambda i, j: (i, 0)),
                pl.BlockSpec((K, tn), lambda i, j: (0, j)),  # constant (fetched once) when grid_n == 1
                pl.BlockSpec((K, tn), lambda i, j: (0, j)),
            ],
            out_specs=pl.BlockSpec((tm, tn), lambda i, j: (i, j)),
        ),
        compiler_params=pltpu.CompilerParams(
            dimension_semantics=("parallel", "parallel"),
            vmem_limit_bytes=vmem_limit,
        ),
        cost_estimate=cost,
    )(x2, w_hi, w_lo)


# ----------------------------------------------------------------------------
# JAX port of the module (parameter setup + glue), Pallas matmul on the hot path
# ----------------------------------------------------------------------------
class TensorTrainProjection:
    def __init__(self, input_dimension, output_multiplier=1, rank=1,
                 init="normal", key=None):
        assert input_dimension % 512 == 0
        input_multiplier = input_dimension // 512
        top_ranks = [2 * input_multiplier] + [2] * 8
        bottom_ranks = [2 * output_multiplier] + [2] * 8
        left_ranks, right_ranks = [], []
        for i in range(9):
            left_ranks.append(1 if i == 0 else rank)
            right_ranks.append(1 if i + 1 == 9 else rank)
        self.top_ranks = top_ranks
        self.bottom_ranks = bottom_ranks
        self.left_ranks = left_ranks
        self.right_ranks = right_ranks

        # Deterministic parameter init (mirrors torch.randn / zeros_).
        keys = jax.random.split(key, 9)
        self.projections = []
        for k, t, b, l, r in zip(keys, top_ranks, bottom_ranks, left_ranks, right_ranks):
            if init == "zeros":
                core = jnp.zeros((t, b, l, r), jnp.float32)
            else:
                core = jax.random.normal(k, (t, b, l, r), jnp.float32)
            self.projections.append(core)

        # TODO(synk): the 9-core merge below is tiny plain-JAX glue done once at init
        # (not a Pallas kernel); rebuild W_hi/W_lo if the cores are ever updated.
        W = self._build_full_matrix()
        # Split-bf16 cache: W ~ W_hi + W_lo to ~2^-16 relative, so the kernel can feed
        # the MXU with bf16 operands while staying well inside the 1e-3 accuracy budget.
        self._W_hi = W.astype(jnp.bfloat16)
        self._W_lo = (W - self._W_hi.astype(jnp.float32)).astype(jnp.bfloat16)

    def _build_full_matrix(self):
        # Merge the 9 TT-cores into the dense (D_in, D_out) matrix.  Mirrors the exact
        # index pattern of the torch `contract` call (note p[7] uses 'hqzy': its
        # left/right rank axes are swapped in the chain).
        p = self.projections
        W = jnp.einsum(
            "ajs,bkst,cltu,dmuv,envw,fowx,gpxy,hqzy,irz->abcdefghijklmnopqr",
            p[0][:, :, 0, :], p[1], p[2], p[3], p[4], p[5], p[6], p[7],
            p[8][:, :, :, 0],
            precision=jax.lax.Precision.HIGHEST,
        )
        d_in = product(self.top_ranks)
        d_out = product(self.bottom_ranks)
        return W.reshape(d_in, d_out)

    def __call__(self, x):
        d_in = product(self.top_ranks)
        d_out = product(self.bottom_ranks)
        assert x.shape[-1] == d_in
        batch_shape = x.shape[:-1]
        M = product(batch_shape)
        if M == 0:  # empty-batch guard
            return jnp.zeros((*batch_shape, d_out), dtype=x.dtype)
        x2 = x.reshape(M, d_in)
        out2 = pallas_tt_projection_matmul(x2, self._W_hi, self._W_lo)
        return out2.reshape(*batch_shape, d_out)

    # Pure-JAX reference replicating the torch forward literally (for checking).
    def reference(self, x):
        batch_shape = x.shape[:-1]
        xr = x.reshape(*batch_shape, *self.top_ranks)
        p = self.projections
        out = jnp.einsum(
            "...abcdefghi,ajs,bkst,cltu,dmuv,envw,fowx,gpxy,hqzy,irz->...jklmnopqr",
            xr, p[0][:, :, 0, :], p[1], p[2], p[3], p[4], p[5], p[6], p[7],
            p[8][:, :, :, 0],
            precision=jax.lax.Precision.HIGHEST,
        )
        return out.reshape(*batch_shape, product(self.bottom_ranks))


if __name__ == "__main__":
    key = jax.random.PRNGKey(0)
    k_param, k_x = jax.random.split(key)

    input_dimension = 512           # smallest legal size (must be % 512 == 0)
    module = TensorTrainProjection(input_dimension, output_multiplier=1, rank=1,
                                   init="normal", key=k_param)

    # small batch=2, seq=8, hidden=512
    x = jax.random.normal(k_x, (2, 8, input_dimension), dtype=jnp.float32)

    out = module(x)
    out = jax.block_until_ready(out)

    assert out.shape == (2, 8, 512), out.shape

    ref = jax.block_until_ready(module.reference(x))
    err = float(jnp.max(jnp.abs(out - ref)))
    scale = float(jnp.max(jnp.abs(ref))) + 1e-6
    assert err <= 1e-3 * scale + 1e-3, f"mismatch: err={err}, scale={scale}"

    print("KERNEL_OK")
</pallas_src>

<mosaic_0001>
module attributes {stable_mosaic.version = 11 : i64} {
  func.func @_tt_matmul_kernel_split_x(%arg0: i32, %arg1: i32, %arg2: memref<16x512xf32, #tpu.memory_space<vmem>>, %arg3: memref<512x512xbf16, #tpu.memory_space<vmem>>, %arg4: memref<512x512xbf16, #tpu.memory_space<vmem>>, %arg5: memref<16x512xf32, #tpu.memory_space<vmem>>) attributes {dimension_semantics = [#tpu.dimension_semantics<parallel>, #tpu.dimension_semantics<parallel>], iteration_bounds = array<i64: 1, 1>, scalar_prefetch = 0 : i64, scratch_operands = 0 : i64, tpu.core_type = #tpu.core_type<tc>, window_params = [{transform_indices = @transform_0, window_bounds = array<i64: 16, 512>}, {transform_indices = @transform_1, window_bounds = array<i64: 512, 512>}, {transform_indices = @transform_2, window_bounds = array<i64: 512, 512>}, {transform_indices = @transform_3, window_bounds = array<i64: 16, 512>}]} {
    %c0 = arith.constant 0 : index
    %c0_0 = arith.constant 0 : index
    %0 = vector.load %arg2[%c0, %c0_0] : memref<16x512xf32, #tpu.memory_space<vmem>>, vector<16x512xf32>
    %1 = arith.truncf %0 : vector<16x512xf32> to vector<16x512xbf16>
    %2 = arith.extf %1 : vector<16x512xbf16> to vector<16x512xf32>
    %3 = arith.subf %0, %2 : vector<16x512xf32>
    %4 = arith.truncf %3 : vector<16x512xf32> to vector<16x512xbf16>
    %c0_1 = arith.constant 0 : index
    %c0_2 = arith.constant 0 : index
    %5 = vector.load %arg3[%c0_1, %c0_2] : memref<512x512xbf16, #tpu.memory_space<vmem>>, vector<512x512xbf16>
    %cst = arith.constant dense<0.000000e+00> : vector<16x512xf32>
    %6 = tpu.matmul %1, %5, %cst {dimension_numbers = #tpu.dot_dimension_numbers<[1], [0], [0], [1], [0, 0, 1, 1], [], []>} : vector<16x512xbf16>, vector<512x512xbf16>, vector<16x512xf32> -> vector<16x512xf32>
    %cst_3 = arith.constant dense<0.000000e+00> : vector<16x512xf32>
    %7 = tpu.matmul %4, %5, %cst_3 {dimension_numbers = #tpu.dot_dimension_numbers<[1], [0], [0], [1], [0, 0, 1, 1], [], []>} : vector<16x512xbf16>, vector<512x512xbf16>, vector<16x512xf32> -> vector<16x512xf32>
    %8 = arith.addf %6, %7 : vector<16x512xf32>
    %c0_4 = arith.constant 0 : index
    %c0_5 = arith.constant 0 : index
    %9 = vector.load %arg4[%c0_4, %c0_5] : memref<512x512xbf16, #tpu.memory_space<vmem>>, vector<512x512xbf16>
    %cst_6 = arith.constant dense<0.000000e+00> : vector<16x512xf32>
    %10 = tpu.matmul %1, %9, %cst_6 {dimension_numbers = #tpu.dot_dimension_numbers<[1], [0], [0], [1], [0, 0, 1, 1], [], []>} : vector<16x512xbf16>, vector<512x512xbf16>, vector<16x512xf32> -> vector<16x512xf32>
    %11 = arith.addf %8, %10 : vector<16x512xf32>
    %c0_7 = arith.constant 0 : index
    %c0_8 = arith.constant 0 : index
    %12 = vector.load %arg5[%c0_7, %c0_8] : memref<16x512xf32, #tpu.memory_space<vmem>>, vector<16x512xf32>
    tpu.vector_store %arg5[%c0_7, %c0_8], %11 {strides = array<i32>} : memref<16x512xf32, #tpu.memory_space<vmem>>, vector<16x512xf32>,
    return
  }
  func.func @transform_0(%arg0: i32, %arg1: i32) -> (i32, i32) {
    %c0_i32 = arith.constant 0 : i32
    %c0_i32_0 = arith.constant 0 : i32
    return %arg0, %c0_i32 : i32, i32
  }
  func.func @transform_1(%arg0: i32, %arg1: i32) -> (i32, i32) {
    %c0_i32 = arith.constant 0 : i32
    %c0_i32_0 = arith.constant 0 : i32
    return %c0_i32, %arg1 : i32, i32
  }
  func.func @transform_2(%arg0: i32, %arg1: i32) -> (i32, i32) {
    %c0_i32 = arith.constant 0 : i32
    %c0_i32_0 = arith.constant 0 : i32
    return %c0_i32, %arg1 : i32, i32
  }
  func.func @transform_3(%arg0: i32, %arg1: i32) -> (i32, i32) {
    %c0_i32 = arith.constant 0 : i32
    return %arg0, %arg1 : i32, i32
  }
}

</mosaic_0001>

<bundles_post_ra>
// kernel: tpu_custom_call.1
= control target key start
LH: loop header
LB: loop body
LE: loop exit
PB: predicated region body
PF: predicated region fallthrough
CT: control target
= control target key end

     0   :  { %8 = vsyncpa [#allocation3], 0  ;;  %s3525_s0 = inlined_call_operand.hbm [shape: f32[16,512], index: 0, kind: input, shape index: {}]   ;;  %s3526_s1 = inlined_call_operand.hbm [shape: bf16[512,512], index: 1, kind: input, shape index: {}]   ;;  %s3527_s2 = inlined_call_operand.hbm [shape: bf16[512,512], index: 2, kind: input, shape index: {}]   ;;  %s3528_s3 = inlined_call_operand.hbm [shape: f32[16,512], index: 3, kind: output, shape index: {}]  }
   0x1   :  { %9 = vsyncpa [#allocation6], 0 }
   0x2   :  { %10 = vsyncpa [#allocation4], 0  ;;  %s2977_s12 = smov [#allocation5]   ;;  %s2883_s16 = scalar_lea.hbm %s3526_s1, 16384 }
   0x3   :  { %s28_s13 = sshll.u32 %s2977_s12, 4  ;;  %p2884_p0 = scmp.ne.s32.totalorder %s3526_s1, %s2883_s16  ;;  %s29_s13 = int_to_ptr.vmem [resolvable:$true] %s28_s13 }
   0x4   :  { %p2887_p1 = scmp.lt.u32.totalorder %s2883_s16, %s3526_s1 }
   0x6   :  { %p2889_p2 = pnand %p2887_p1, %p2884_p0 }
   0x8   :  { %2892 = shalt.err (!%p2889_p2)
}
   0x9   :  { %s2893_s21 = scalar_lea.vmem %s29_s13, 16384  ;;  %p2898_p4 = scmp.lt.s32.totalorder %s29_s13, %s29_s13 }
   0xa   :  { %p2894_p3 = scmp.ne.s32.totalorder %s29_s13, %s2893_s21  ;;  %p2899_p5 = scmp.lt.s32.totalorder %s2893_s21, %s2893_s21 }
   0xc   :  { %p2900_p6 = por %p2899_p5, %p2898_p4 }
   0xe   :  { %p2901_p7 = pnand %p2900_p6, %p2894_p3 }
  0x10   :  { %2904 = shalt.err (!%p2901_p7)
}
  0x11   :  { %s2978_s22 = smov 256   ;;  %s2979_s23 = smov 16  }
  0x12   :  { %34 = dma.hbm_to_vmem [thread:$0]  %s3526_s1, 16384, %s29_s13, [#allocation6], %s2978_s22, %s2978_s22, %s2979_s23  }
  0x13   :  { %s2980_s26 = smov [#allocation2]   ;;  %s2905_s30 = scalar_lea.hbm %s3525_s0, 1024 }
  0x14   :  { %s16_s27 = sshll.u32 %s2980_s26, 4  ;;  %p2906_p8 = scmp.ne.s32.totalorder %s3525_s0, %s2905_s30  ;;  %s17_s27 = int_to_ptr.vmem [resolvable:$true] %s16_s27 }
  0x15   :  { %p2909_p9 = scmp.lt.u32.totalorder %s2905_s30, %s3525_s0 }
  0x17   :  { %p2911_p10 = pnand %p2909_p9, %p2906_p8 }
  0x19   :  { %2914 = shalt.err (!%p2911_p10)
}
  0x1a   :  { %s2915_s8 = scalar_lea.vmem %s17_s27, 1024  ;;  %p2920_p12 = scmp.lt.s32.totalorder %s17_s27, %s17_s27 }
  0x1b   :  { %p2916_p11 = scmp.ne.s32.totalorder %s17_s27, %s2915_s8  ;;  %p2921_p13 = scmp.lt.s32.totalorder %s2915_s8, %s2915_s8 }
  0x1d   :  { %p2922_p0 = por %p2921_p13, %p2920_p12 }
  0x1f   :  { %p2923_p1 = pnand %p2922_p0, %p2916_p11 }
  0x21   :  { %2926 = shalt.err (!%p2923_p1)
}
  0x22   :  { %s2981_s1 = smov 512   ;;  %s2982_s9 = smov 32  }
  0x23   :  { %22 = dma.hbm_to_vmem [thread:$0]  %s3525_s0, 1024, %s17_s27, [#allocation3], %s2981_s1, %s2981_s1, %s2982_s9  }
  0x24   :  { %s2983_s12 = smov [#allocation7]   ;;  %s2927_s16 = scalar_lea.hbm %s3527_s2, 16384 }
  0x25   :  { %s40_s13 = sshll.u32 %s2983_s12, 4  ;;  %p2928_p2 = scmp.ne.s32.totalorder %s3527_s2, %s2927_s16  ;;  %s41_s13 = int_to_ptr.vmem [resolvable:$true] %s40_s13 }
  0x26   :  { %p2931_p3 = scmp.lt.u32.totalorder %s2927_s16, %s3527_s2 }
  0x28   :  { %p2933_p4 = pnand %p2931_p3, %p2928_p2 }
  0x2a   :  { %2936 = shalt.err (!%p2933_p4)
}
  0x2b   :  { %s2937_s21 = scalar_lea.vmem %s41_s13, 16384  ;;  %p2942_p6 = scmp.lt.s32.totalorder %s41_s13, %s41_s13 }
  0x2c   :  { %p2938_p5 = scmp.ne.s32.totalorder %s41_s13, %s2937_s21  ;;  %p2943_p7 = scmp.lt.s32.totalorder %s2937_s21, %s2937_s21 }
  0x2e   :  { %p2944_p8 = por %p2943_p7, %p2942_p6 }
  0x30   :  { %p2945_p9 = pnand %p2944_p8, %p2938_p5 }
  0x32   :  { %2948 = shalt.err (!%p2945_p9)
}
  0x33   :  { %46 = dma.hbm_to_vmem [thread:$0]  %s3527_s2, 16384, %s41_s13, [#allocation6], %s2978_s22, %s2978_s22, %s2979_s23  }
  0x34   :  { %2971 = dma.done.wait [#allocation3], 1024  }
  0x35   :  { %2972 = vsyncadd [#allocation3], 4294966272 }
  0x36   :  { %2973 = dma.done.wait [#allocation6], 32768  }
  0x37   :  { %2974 = vsyncadd [#allocation6], 4294934528  ;;  %v2478_v0 = vld [vmem:[#allocation5 + $0x4] ss:$16 sps:$4 sm:$0xff]   ;;  %v2480_v1 = vld [vmem:[#allocation5 + $0xc] ss:$16 sps:$4 sm:$0xff]  }
  0x38   :  { %856 = vmatprep.subr.bf16.mxu0 %v2478_v0  ;;  %v2482_v2 = vld [vmem:[#allocation5] ss:$16 sps:$4 sm:$0xff]   ;;  %v2483_v3 = vld [vmem:[#allocation5 + $0x8] ss:$16 sps:$4 sm:$0xff]   ;;  %942 = vmatprep.subr.bf16.mxu1 %v2480_v1  ;;  %v2484_v4 = vld [vmem:[#allocation5 + $0x24] ss:$16 sps:$4 sm:$0xff]  }
  0x39   :  { %857 = vmatpush1.bf16.msra.mxu0 %v2482_v2  ;;  %943 = vmatpush1.bf16.msra.mxu1 %v2483_v3  ;;  %v2486_v5 = vld [vmem:[#allocation5 + $0x2c] ss:$16 sps:$4 sm:$0xff]   ;;  %v2488_v6 = vld [vmem:[#allocation5 + $0x20] ss:$16 sps:$4 sm:$0xff]   ;;  %v2489_v7 = vld [vmem:[#allocation5 + $0x28] ss:$16 sps:$4 sm:$0xff]  }
  0x3a   :  { %858 = vmatprep.subr.bf16.mxu0 %v2484_v4  ;;  %944 = vmatprep.subr.bf16.mxu1 %v2486_v5  ;;  %v2490_v8 = vld [vmem:[#allocation5 + $0x44] ss:$16 sps:$4 sm:$0xff]   ;;  %v2492_v9 = vld [vmem:[#allocation5 + $0x4c] ss:$16 sps:$4 sm:$0xff]   ;;  %v2494_v10 = vld [vmem:[#allocation5 + $0x40] ss:$16 sps:$4 sm:$0xff]  }
  0x3b   :  { %v2495_v11 = vld [vmem:[#allocation5 + $0x48] ss:$16 sps:$4 sm:$0xff]   ;;  %v2496_v12 = vld [vmem:[#allocation5 + $0x64] ss:$16 sps:$4 sm:$0xff]   ;;  %v2498_v13 = vld [vmem:[#allocation5 + $0x6c] ss:$16 sps:$4 sm:$0xff]  }
  0x3c   :  { %v2500_v14 = vld [vmem:[#allocation5 + $0x60] ss:$16 sps:$4 sm:$0xff]   ;;  %v2501_v15 = vld [vmem:[#allocation5 + $0x68] ss:$16 sps:$4 sm:$0xff]   ;;  %v2502_v16 = vld [vmem:[#allocation5 + $0x84] ss:$16 sps:$4 sm:$0xff]  }
  0x3d   :  { %859 = vmatpush1.bf16.msra.mxu0 %v2488_v6  ;;  %945 = vmatpush1.bf16.msra.mxu1 %v2489_v7  ;;  %v2504_v17 = vld [vmem:[#allocation5 + $0x8c] ss:$16 sps:$4 sm:$0xff]   ;;  %v2506_v18 = vld [vmem:[#allocation5 + $0x80] ss:$16 sps:$4 sm:$0xff]   ;;  %v2507_v19 = vld [vmem:[#allocation5 + $0x88] ss:$16 sps:$4 sm:$0xff]  }
  0x3e   :  { %860 = vmatprep.subr.bf16.mxu0 %v2490_v8  ;;  %946 = vmatprep.subr.bf16.mxu1 %v2492_v9  ;;  %v2508_v20 = vld [vmem:[#allocation5 + $0xa4] ss:$16 sps:$4 sm:$0xff]   ;;  %v3050_v21 = vld [vmem:[#allocation5 + $0xac] ss:$16 sps:$4 sm:$0xff]   ;;  %v3052_v22 = vld [vmem:[#allocation5 + $0xa0] ss:$16 sps:$4 sm:$0xff]  }
  0x3f   :  { %v3054_v23 = vld [vmem:[#allocation5 + $0xa8] ss:$16 sps:$4 sm:$0xff]   ;;  %v3056_v24 = vld [vmem:[#allocation5 + $0xc4] ss:$16 sps:$4 sm:$0xff]   ;;  %v3059_v25 = vld [vmem:[#allocation5 + $0xcc] ss:$16 sps:$4 sm:$0xff]  }
  0x40   :  { %v3061_v26 = vld [vmem:[#allocation5 + $0xc0] ss:$16 sps:$4 sm:$0xff]   ;;  %v3063_v27 = vld [vmem:[#allocation5 + $0xc8] ss:$16 sps:$4 sm:$0xff]   ;;  %v3067_v28 = vld [vmem:[#allocation5 + $0xe4] ss:$16 sps:$4 sm:$0xff]  }
  0x41   :  { %861 = vmatpush1.bf16.msra.mxu0 %v2494_v10  ;;  %947 = vmatpush1.bf16.msra.mxu1 %v2495_v11  ;;  %v3071_v29 = vld [vmem:[#allocation5 + $0xec] ss:$16 sps:$4 sm:$0xff]   ;;  %v3073_v30 = vld [vmem:[#allocation5 + $0xe0] ss:$16 sps:$4 sm:$0xff]   ;;  %v3077_v31 = vld [vmem:[#allocation5 + $0xe8] ss:$16 sps:$4 sm:$0xff]  }
  0x42   :  { %862 = vmatprep.subr.bf16.mxu0 %v2496_v12  ;;  %948 = vmatprep.subr.bf16.mxu1 %v2498_v13  ;;  %v3079_v32 = vld [vmem:[#allocation5 + $0x104] ss:$16 sps:$4 sm:$0xff]   ;;  %v3083_v33 = vld [vmem:[#allocation5 + $0x10c] ss:$16 sps:$4 sm:$0xff]   ;;  %v3085_v34 = vld [vmem:[#allocation5 + $0x100] ss:$16 sps:$4 sm:$0xff]  }
  0x43   :  { %v3087_v35 = vld [vmem:[#allocation5 + $0x108] ss:$16 sps:$4 sm:$0xff]   ;;  %v3091_v36 = vld [vmem:[#allocation5 + $0x124] ss:$16 sps:$4 sm:$0xff]   ;;  %v3095_v37 = vld [vmem:[#allocation5 + $0x12c] ss:$16 sps:$4 sm:$0xff]  }
  0x44   :  { %v3097_v38 = vld [vmem:[#allocation5 + $0x120] ss:$16 sps:$4 sm:$0xff]   ;;  %v3101_v39 = vld [vmem:[#allocation5 + $0x128] ss:$16 sps:$4 sm:$0xff]   ;;  %v3103_v40 = vld [vmem:[#allocation5 + $0x144] ss:$16 sps:$4 sm:$0xff]  }
  0x45   :  { %863 = vmatpush1.bf16.msra.mxu0 %v2500_v14  ;;  %949 = vmatpush1.bf16.msra.mxu1 %v2501_v15  ;;  %v3107_v41 = vld [vmem:[#allocation5 + $0x14c] ss:$16 sps:$4 sm:$0xff]   ;;  %v3109_v42 = vld [vmem:[#allocation5 + $0x140] ss:$16 sps:$4 sm:$0xff]   ;;  %v3111_v43 = vld [vmem:[#allocation5 + $0x148] ss:$16 sps:$4 sm:$0xff]  }
  0x46   :  { %864 = vmatprep.subr.bf16.mxu0 %v2502_v16  ;;  %950 = vmatprep.subr.bf16.mxu1 %v2504_v17  ;;  %v3115_v44 = vld [vmem:[#allocation5 + $0x164] ss:$16 sps:$4 sm:$0xff]   ;;  %v3119_v45 = vld [vmem:[#allocation5 + $0x16c] ss:$16 sps:$4 sm:$0xff]   ;;  %v3123_v48 = vld [vmem:[#allocation5 + $0x160] ss:$16 sps:$4 sm:$0xff]  }
  0x47   :  { %v57_v46 = vld [vmem:[#allocation2 + $0x8] sm:$0xff]  ;;  %v3131_v51 = vld [vmem:[#allocation5 + $0x184] ss:$16 sps:$4 sm:$0xff]   ;;  %v3135_v53 = vld [vmem:[#allocation5 + $0x180] ss:$16 sps:$4 sm:$0xff]   ;;  %s2984_s2 = smov [#allocation8]  }
  0x48   :  { %v61_v47 = vld [vmem:[#allocation2 + $0x28] sm:$0xff]  ;;  %v3141_v57 = vld [vmem:[#allocation5 + $0x1a4] ss:$16 sps:$4 sm:$0xff]   ;;  %v3149_v0 = vld [vmem:[#allocation5 + $0x1a0] ss:$16 sps:$4 sm:$0xff]   ;;  %s2161_s22 = sshll.u32 %s2984_s2, 4  ;;  %s2162_s22 = int_to_ptr.vmem [resolvable:$true] %s2161_s22 }
  0x49   :  { %865 = vmatpush1.bf16.msra.mxu0 %v2506_v18  ;;  %951 = vmatpush1.bf16.msra.mxu1 %v2507_v19  ;;  %v3125_v49 = vld [vmem:[#allocation5 + $0x168] ss:$16 sps:$4 sm:$0xff]   ;;  %v3127_v50 = vpack.c.bf16 %v61_v47, %v57_v46  ;;  %v3133_v52 = vld [vmem:[#allocation5 + $0x18c] ss:$16 sps:$4 sm:$0xff]   ;;  %v56_v58 = vld [vmem:[#allocation2] sm:$0xff]  ;;  %s2949_s23 = scalar_lea.vmem %s2162_s22, 1024  ;;  %p2954_p11 = scmp.lt.s32.totalorder %s2162_s22, %s2162_s22 }
  0x4a   :  { %866 = vmatprep.subr.bf16.mxu0 %v2508_v20  ;;  %952 = vmatprep.subr.bf16.mxu1 %v3050_v21  ;;  %v3137_v54 = vld [vmem:[#allocation5 + $0x188] ss:$16 sps:$4 sm:$0xff]   ;;  %v60_v61 = vld [vmem:[#allocation2 + $0x20] sm:$0xff]  ;;  %v3147_v62 = vld [vmem:[#allocation5 + $0x1ac] ss:$16 sps:$4 sm:$0xff]   ;;  %p2950_p10 = scmp.ne.s32.totalorder %s2162_s22, %s2949_s23  ;;  %p2955_p12 = scmp.lt.s32.totalorder %s2949_s23, %s2949_s23 }
  0x4b   :  { %3591 = vst [vmem:[#allocation12_spill] sm:$0xff] %v3127_v50  ;;  %v69_v55 = vunpack.c.l.bf16 %v3127_v50  ;;  %v73_v56 = vunpack.c.h.bf16 %v3127_v50  ;;  %v3151_v1 = vld [vmem:[#allocation5 + $0x1a8] ss:$16 sps:$4 sm:$0xff]   ;;  %v3153_v2 = vpack.c.bf16 %v60_v61, %v56_v58  ;;  %v3157_v3 = vld [vmem:[#allocation5 + $0x1c4] ss:$16 sps:$4 sm:$0xff]  }
  0x4c   :  { %v3161_v4 = vld [vmem:[#allocation5 + $0x1cc] ss:$16 sps:$4 sm:$0xff]   ;;  %v3163_v5 = vld [vmem:[#allocation5 + $0x1c0] ss:$16 sps:$4 sm:$0xff]   ;;  %v3165_v6 = vld [vmem:[#allocation5 + $0x1c8] ss:$16 sps:$4 sm:$0xff]   ;;  %p2956_p13 = por %p2955_p12, %p2954_p11 }
  0x4d   :  { %867 = vmatpush1.bf16.msra.mxu0 %v3052_v22  ;;  %953 = vmatpush1.bf16.msra.mxu1 %v3054_v23  ;;  %v77_v59 = vsub.f32 %v57_v46, %v69_v55  ;;  %v81_v60 = vsub.f32 %v61_v47, %v73_v56  ;;  %3592 = vst [vmem:[#allocation13_spill] sm:$0xff] %v3153_v2  ;;  %v68_v7 = vunpack.c.l.bf16 %v3153_v2  ;;  %v72_v8 = vunpack.c.h.bf16 %v3153_v2  ;;  %v3171_v9 = vld [vmem:[#allocation5 + $0x1e4] ss:$16 sps:$4 sm:$0xff]   ;;  %v3175_v10 = vld [vmem:[#allocation5 + $0x1ec] ss:$16 sps:$4 sm:$0xff]  }
  0x4e   :  { %868 = vmatprep.subr.bf16.mxu0 %v3056_v24  ;;  %954 = vmatprep.subr.bf16.mxu1 %v3059_v25  ;;  %v3177_v11 = vld [vmem:[#allocation5 + $0x1e0] ss:$16 sps:$4 sm:$0xff]   ;;  %v3179_v12 = vld [vmem:[#allocation5 + $0x1e8] ss:$16 sps:$4 sm:$0xff]   ;;  %v3183_v15 = vld [vmem:[#allocation5 + $0x204] ss:$16 sps:$4 sm:$0xff]   ;;  %p2957_p0 = pnand %p2956_p13, %p2950_p10 }
  0x4f   :  { %v85_v63 = vpack.c.bf16 %v81_v60, %v77_v59  ;;  %v76_v13 = vsub.f32 %v56_v58, %v68_v7  ;;  %v80_v14 = vsub.f32 %v60_v61, %v72_v8  ;;  %v3187_v16 = vld [vmem:[#allocation5 + $0x20c] ss:$16 sps:$4 sm:$0xff]   ;;  %v3189_v17 = vld [vmem:[#allocation5 + $0x200] ss:$16 sps:$4 sm:$0xff]   ;;  %v3191_v18 = vld [vmem:[#allocation5 + $0x208] ss:$16 sps:$4 sm:$0xff]  }
  0x50   :  { %3593 = vst [vmem:[#allocation14_spill] sm:$0xff] %v3187_v16  ;;  %3594 = vst [vmem:[#allocation15_spill] sm:$0xff] %v3189_v17  ;;  %v3195_v20 = vld [vmem:[#allocation5 + $0x224] ss:$16 sps:$4 sm:$0xff]   ;;  %v3199_v46 = vld [vmem:[#allocation5 + $0x22c] ss:$16 sps:$4 sm:$0xff]  }
  0x51   :  { %869 = vmatpush1.bf16.msra.mxu0 %v3061_v26  ;;  %955 = vmatpush1.bf16.msra.mxu1 %v3063_v27  ;;  %3595 = vst [vmem:[#allocation16_spill] sm:$0xff] %v3191_v18  ;;  %v84_v19 = vpack.c.bf16 %v80_v14, %v76_v13  ;;  %3596 = vst [vmem:[#allocation17_spill] sm:$0xff] %v3195_v20  ;;  %v3201_v47 = vld [vmem:[#allocation5 + $0x220] ss:$16 sps:$4 sm:$0xff]   ;;  %v3203_v55 = vld [vmem:[#allocation5 + $0x228] ss:$16 sps:$4 sm:$0xff]  }
  0x52   :  { %870 = vmatprep.subr.bf16.mxu0 %v3067_v28  ;;  %956 = vmatprep.subr.bf16.mxu1 %v3071_v29  ;;  %3597 = vst [vmem:[#allocation18_spill] sm:$0xff] %v3199_v46  ;;  %3598 = vst [vmem:[#allocation19_spill] sm:$0xff] %v3201_v47  ;;  %v3207_v56 = vld [vmem:[#allocation5 + $0x244] ss:$16 sps:$4 sm:$0xff]   ;;  %v3211_v58 = vld [vmem:[#allocation5 + $0x24c] ss:$16 sps:$4 sm:$0xff]  }
  0x53   :  { %888 = vmatprep.mubr.bf16.mxu0 %v85_v63  ;;  %974 = vmatprep.mubr.bf16.mxu1 %v85_v63  ;;  %3599 = vst [vmem:[#allocation20_spill] sm:$0xff] %v3203_v55  ;;  %3600 = vst [vmem:[#allocation21_spill] sm:$0xff] %v3207_v56  ;;  %v3213_v59 = vld [vmem:[#allocation5 + $0x240] ss:$16 sps:$4 sm:$0xff]   ;;  %v3215_v60 = vld [vmem:[#allocation5 + $0x248] ss:$16 sps:$4 sm:$0xff]  }
  0x54   :  { %3601 = vst [vmem:[#allocation22_spill] sm:$0xff] %v3211_v58  ;;  %3602 = vst [vmem:[#allocation23_spill] sm:$0xff] %v3213_v59  ;;  %v3219_v61 = vld [vmem:[#allocation5 + $0x264] ss:$16 sps:$4 sm:$0xff]   ;;  %v3223_v63 = vld [vmem:[#allocation5 + $0x26c] ss:$16 sps:$4 sm:$0xff]  }
  0x55   :  { %871 = vmatpush1.bf16.msra.mxu0 %v3073_v30  ;;  %957 = vmatpush1.bf16.msra.mxu1 %v3077_v31  ;;  %3603 = vst [vmem:[#allocation24_spill] sm:$0xff] %v3215_v60  ;;  %3604 = vst [vmem:[#allocation25_spill] sm:$0xff] %v3219_v61  ;;  %v3225_v7 = vld [vmem:[#allocation5 + $0x260] ss:$16 sps:$4 sm:$0xff]   ;;  %v3227_v8 = vld [vmem:[#allocation5 + $0x268] ss:$16 sps:$4 sm:$0xff]  }
  0x56   :  { %872 = vmatprep.subr.bf16.mxu0 %v3079_v32  ;;  %958 = vmatprep.subr.bf16.mxu1 %v3083_v33  ;;  %3605 = vst [vmem:[#allocation26_spill] sm:$0xff] %v3223_v63  ;;  %3606 = vst [vmem:[#allocation27_spill] sm:$0xff] %v3225_v7  ;;  %v3231_v13 = vld [vmem:[#allocation5 + $0x284] ss:$16 sps:$4 sm:$0xff]   ;;  %v3235_v14 = vld [vmem:[#allocation5 + $0x28c] ss:$16 sps:$4 sm:$0xff]  }
  0x57   :  { %3607 = vst [vmem:[#allocation28_spill] sm:$0xff] %v3227_v8  ;;  %3608 = vst [vmem:[#allocation29_spill] sm:$0xff] %v3231_v13 }
  0x58   :  { %3609 = vst [vmem:[#allocation30_spill] sm:$0xff] %v3235_v14 }
  0x59   :  { %873 = vmatpush1.bf16.msra.mxu0 %v3085_v34  ;;  %959 = vmatpush1.bf16.msra.mxu1 %v3087_v35 }
  0x5a   :  { %874 = vmatprep.subr.bf16.mxu0 %v3091_v36  ;;  %960 = vmatprep.subr.bf16.mxu1 %v3095_v37 }
  0x5d   :  { %875 = vmatpush1.bf16.msra.mxu0 %v3097_v38  ;;  %961 = vmatpush1.bf16.msra.mxu1 %v3101_v39 }
  0x5e   :  { %876 = vmatprep.subr.bf16.mxu0 %v3103_v40  ;;  %962 = vmatprep.subr.bf16.mxu1 %v3107_v41 }
  0x61   :  { %877 = vmatpush1.bf16.msra.mxu0 %v3109_v42  ;;  %963 = vmatpush1.bf16.msra.mxu1 %v3111_v43 }
  0x62   :  { %878 = vmatprep.subr.bf16.mxu0 %v3115_v44  ;;  %964 = vmatprep.subr.bf16.mxu1 %v3119_v45 }
  0x65   :  { %879 = vmatpush1.bf16.msra.mxu0 %v3123_v48  ;;  %965 = vmatpush1.bf16.msra.mxu1 %v3125_v49 }
  0x66   :  { %880 = vmatprep.subr.bf16.mxu0 %v3131_v51  ;;  %966 = vmatprep.subr.bf16.mxu1 %v3133_v52 }
  0x69   :  { %881 = vmatpush1.bf16.msra.mxu0 %v3135_v53  ;;  %967 = vmatpush1.bf16.msra.mxu1 %v3137_v54 }
  0x6a   :  { %882 = vmatprep.subr.bf16.mxu0 %v3141_v57  ;;  %968 = vmatprep.subr.bf16.mxu1 %v3147_v62 }
  0x6d   :  { %883 = vmatpush1.bf16.msra.mxu0 %v3149_v0  ;;  %969 = vmatpush1.bf16.msra.mxu1 %v3151_v1 }
  0x6e   :  { %884 = vmatprep.subr.bf16.mxu0 %v3157_v3  ;;  %970 = vmatprep.subr.bf16.mxu1 %v3161_v4 }
  0x71   :  { %885 = vmatpush1.bf16.msra.mxu0 %v3163_v5  ;;  %971 = vmatpush1.bf16.msra.mxu1 %v3165_v6 }
  0x72   :  { %886 = vmatprep.subr.bf16.mxu0 %v3171_v9  ;;  %972 = vmatprep.subr.bf16.mxu1 %v3175_v10 }
  0x75   :  { %887 = vmatpush1.bf16.msra.mxu0 %v3177_v11  ;;  %973 = vmatpush1.bf16.msra.mxu1 %v3179_v12 }
  0x76   :  { %899 = vmatprep.subr.bf16.mxu0 %v3183_v15  ;;  %985 = vmatprep.subr.bf16.mxu1 %v3187_v16  ;;  %v3295_v16 = vld [vmem:[#allocation5 + $0x32c] ss:$16 sps:$4 sm:$0xff]  }
  0x77   :  { %3628 = vst [vmem:[#allocation49_spill] sm:$0xff] %v3295_v16 }
  0x78   :  { %889 = vmatmul.mubr.bf16.vlgmr.msra.gmra.mrb[0].mxu0 %v84_v19  ;;  %975 = vmatmul.mubr.bf16.vlgmr.msra.gmra.mrb[0].mxu1 %v84_v19  ;;  %v3237_v19 = vld [vmem:[#allocation5 + $0x280] ss:$16 sps:$4 sm:$0xff]  }
  0x79   :  { %900 = vmatpush1.bf16.msra.mxu0 %v3189_v17  ;;  %986 = vmatpush1.bf16.msra.mxu1 %v3191_v18  ;;  %3610 = vst [vmem:[#allocation31_spill] sm:$0xff] %v3237_v19  ;;  %v3281_v18 = vld [vmem:[#allocation5 + $0x304] ss:$16 sps:$4 sm:$0xff]   ;;  %v3283_v17 = vld [vmem:[#allocation5 + $0x30c] ss:$16 sps:$4 sm:$0xff]  }
  0x7a   :  { %901 = vmatprep.subr.bf16.mxu0 %v3195_v20  ;;  %987 = vmatprep.subr.bf16.mxu1 %v3199_v46  ;;  %3623 = vst [vmem:[#allocation44_spill] sm:$0xff] %v3281_v18  ;;  %3624 = vst [vmem:[#allocation45_spill] sm:$0xff] %v3283_v17 }
  0x7d   :  { %902 = vmatpush1.bf16.msra.mxu0 %v3201_v47  ;;  %988 = vmatpush1.bf16.msra.mxu1 %v3203_v55  ;;  %v3265_v55 = vld [vmem:[#allocation5 + $0x2e4] ss:$16 sps:$4 sm:$0xff]   ;;  %v3267_v47 = vld [vmem:[#allocation5 + $0x2ec] ss:$16 sps:$4 sm:$0xff]  }
  0x7e   :  { %903 = vmatprep.subr.bf16.mxu0 %v3207_v56  ;;  %989 = vmatprep.subr.bf16.mxu1 %v3211_v58  ;;  %v3239_v58 = vld [vmem:[#allocation5 + $0x288] ss:$16 sps:$4 sm:$0xff]   ;;  %v3243_v56 = vld [vmem:[#allocation5 + $0x2a4] ss:$16 sps:$4 sm:$0xff]   ;;  %3618 = vst [vmem:[#allocation39_spill] sm:$0xff] %v3265_v55  ;;  %3619 = vst [vmem:[#allocation40_spill] sm:$0xff] %v3267_v47 }
  0x7f   :  { %3611 = vst [vmem:[#allocation32_spill] sm:$0xff] %v3239_v58  ;;  %3612 = vst [vmem:[#allocation33_spill] sm:$0xff] %v3243_v56 }
  0x81   :  { %904 = vmatpush1.bf16.msra.mxu0 %v3213_v59  ;;  %990 = vmatpush1.bf16.msra.mxu1 %v3215_v60  ;;  %v3247_v60 = vld [vmem:[#allocation5 + $0x2ac] ss:$16 sps:$4 sm:$0xff]   ;;  %v3255_v59 = vld [vmem:[#allocation5 + $0x2c4] ss:$16 sps:$4 sm:$0xff]  }
  0x82   :  { %905 = vmatprep.subr.bf16.mxu0 %v3219_v61  ;;  %991 = vmatprep.subr.bf16.mxu1 %v3223_v63  ;;  %3613 = vst [vmem:[#allocation34_spill] sm:$0xff] %v3247_v60  ;;  %v3249_v61 = vld [vmem:[#allocation5 + $0x2a0] ss:$16 sps:$4 sm:$0xff]   ;;  %v3251_v63 = vld [vmem:[#allocation5 + $0x2a8] ss:$16 sps:$4 sm:$0xff]   ;;  %3616 = vst [vmem:[#allocation37_spill] sm:$0xff] %v3255_v59 }
  0x83   :  { %3614 = vst [vmem:[#allocation35_spill] sm:$0xff] %v3249_v61  ;;  %3615 = vst [vmem:[#allocation36_spill] sm:$0xff] %v3251_v63 }
  0x85   :  { %906 = vmatpush1.bf16.msra.mxu0 %v3225_v7  ;;  %992 = vmatpush1.bf16.msra.mxu1 %v3227_v8  ;;  %v3259_v8 = vld [vmem:[#allocation5 + $0x2cc] ss:$16 sps:$4 sm:$0xff]  }
  0x86   :  { %907 = vmatprep.subr.bf16.mxu0 %v3231_v13  ;;  %993 = vmatprep.subr.bf16.mxu1 %v3235_v14  ;;  %3617 = vst [vmem:[#allocation38_spill] sm:$0xff] %v3259_v8  ;;  %v3261_v13 = vld [vmem:[#allocation5 + $0x2c0] ss:$16 sps:$4 sm:$0xff]   ;;  %v3263_v14 = vld [vmem:[#allocation5 + $0x2c8] ss:$16 sps:$4 sm:$0xff]  }
  0x87   :  { %v59_v7 = vld [vmem:[#allocation2 + $0x18] sm:$0xff] }
  0x89   :  { %908 = vmatpush1.bf16.msra.mxu0 %v3237_v19  ;;  %994 = vmatpush1.bf16.msra.mxu1 %v3239_v58  ;;  %v63_v19 = vld [vmem:[#allocation2 + $0x38] sm:$0xff] }
  0x8a   :  { %909 = vmatprep.subr.bf16.mxu0 %v3243_v56  ;;  %995 = vmatprep.subr.bf16.mxu1 %v3247_v60  ;;  %v3271_v58 = vpack.c.bf16 %v63_v19, %v59_v7  ;;  %v3275_v60 = vld [vmem:[#allocation5 + $0x2e0] ss:$16 sps:$4 sm:$0xff]   ;;  %v3277_v56 = vld [vmem:[#allocation5 + $0x2e8] ss:$16 sps:$4 sm:$0xff]  }
  0x8b   :  { %3621 = vst [vmem:[#allocation42_spill] sm:$0xff] %v3275_v60  ;;  %3622 = vst [vmem:[#allocation43_spill] sm:$0xff] %v3277_v56 }
  0x8c   :  { %3620 = vst [vmem:[#allocation41_spill] sm:$0xff] %v3271_v58  ;;  %v71_v46 = vunpack.c.l.bf16 %v3271_v58  ;;  %v75_v20 = vunpack.c.h.bf16 %v3271_v58  ;;  %v3293_v58 = vld [vmem:[#allocation5 + $0x324] ss:$16 sps:$4 sm:$0xff]  }
  0x8d   :  { %910 = vmatpush1.bf16.msra.mxu0 %v3249_v61  ;;  %996 = vmatpush1.bf16.msra.mxu1 %v3251_v63  ;;  %v3291_v61 = vld [vmem:[#allocation5 + $0x308] ss:$16 sps:$4 sm:$0xff]   ;;  %3627 = vst [vmem:[#allocation48_spill] sm:$0xff] %v3293_v58 }
  0x8e   :  { %911 = vmatprep.subr.bf16.mxu0 %v3255_v59  ;;  %997 = vmatprep.subr.bf16.mxu1 %v3259_v8  ;;  %v79_v63 = vsub.f32 %v59_v7, %v71_v46  ;;  %v83_v59 = vsub.f32 %v63_v19, %v75_v20  ;;  %v3289_v8 = vld [vmem:[#allocation5 + $0x300] ss:$16 sps:$4 sm:$0xff]   ;;  %3626 = vst [vmem:[#allocation47_spill] sm:$0xff] %v3291_v61  ;;  %v3303_v46 = vld [vmem:[#allocation5 + $0x328] ss:$16 sps:$4 sm:$0xff]  }
  0x8f   :  { %3625 = vst [vmem:[#allocation46_spill] sm:$0xff] %v3289_v8  ;;  %v3301_v20 = vld [vmem:[#allocation5 + $0x320] ss:$16 sps:$4 sm:$0xff]   ;;  %3630 = vst [vmem:[#allocation51_spill] sm:$0xff] %v3303_v46  ;;  %v3305_v7 = vld [vmem:[#allocation5 + $0x344] ss:$16 sps:$4 sm:$0xff]  }
  0x90   :  { %v87_v2 = vpack.c.bf16 %v83_v59, %v79_v63  ;;  %3629 = vst [vmem:[#allocation50_spill] sm:$0xff] %v3301_v20  ;;  %3631 = vst [vmem:[#allocation52_spill] sm:$0xff] %v3305_v7  ;;  %v3307_v59 = vld [vmem:[#allocation5 + $0x34c] ss:$16 sps:$4 sm:$0xff]   ;;  %v3313_v63 = vld [vmem:[#allocation5 + $0x340] ss:$16 sps:$4 sm:$0xff]  }
  0x91   :  { %912 = vmatpush1.bf16.msra.mxu0 %v3261_v13  ;;  %998 = vmatpush1.bf16.msra.mxu1 %v3263_v14  ;;  %3632 = vst [vmem:[#allocation53_spill] sm:$0xff] %v3307_v59  ;;  %3633 = vst [vmem:[#allocation54_spill] sm:$0xff] %v3313_v63  ;;  %v3315_v19 = vld [vmem:[#allocation5 + $0x348] ss:$16 sps:$4 sm:$0xff]  }
  0x92   :  { %913 = vmatprep.subr.bf16.mxu0 %v3265_v55  ;;  %999 = vmatprep.subr.bf16.mxu1 %v3267_v47  ;;  %3634 = vst [vmem:[#allocation55_spill] sm:$0xff] %v3315_v19 }
  0x93   :  { %931 = vmatprep.mubr.bf16.mxu0 %v87_v2  ;;  %1017 = vmatprep.mubr.bf16.mxu1 %v87_v2  ;;  %v3325_v2 = vld [vmem:[#allocation5 + $0x360] ss:$16 sps:$4 sm:$0xff]  }
  0x94   :  { %3637 = vst [vmem:[#allocation58_spill] sm:$0xff] %v3325_v2 }
  0x95   :  { %914 = vmatpush1.bf16.msra.mxu0 %v3275_v60  ;;  %1000 = vmatpush1.bf16.msra.mxu1 %v3277_v56  ;;  %v3343_v56 = vld [vmem:[#allocation5 + $0x3ac] ss:$16 sps:$4 sm:$0xff]  }
  0x96   :  { %915 = vmatprep.subr.bf16.mxu0 %v3281_v18  ;;  %1001 = vmatprep.subr.bf16.mxu1 %v3283_v17  ;;  %v3317_v17 = vld [vmem:[#allocation5 + $0x364] ss:$16 sps:$4 sm:$0xff]   ;;  %v3319_v18 = vld [vmem:[#allocation5 + $0x36c] ss:$16 sps:$4 sm:$0xff]   ;;  %3644 = vst [vmem:[#allocation65_spill] sm:$0xff] %v3343_v56 }
  0x97   :  { %3635 = vst [vmem:[#allocation56_spill] sm:$0xff] %v3317_v17  ;;  %3636 = vst [vmem:[#allocation57_spill] sm:$0xff] %v3319_v18 }
  0x99   :  { %916 = vmatpush1.bf16.msra.mxu0 %v3289_v8  ;;  %1002 = vmatpush1.bf16.msra.mxu1 %v3291_v61  ;;  %v3331_v61 = vld [vmem:[#allocation5 + $0x38c] ss:$16 sps:$4 sm:$0xff]   ;;  %v3341_v8 = vld [vmem:[#allocation5 + $0x3a4] ss:$16 sps:$4 sm:$0xff]  }
  0x9a   :  { %917 = vmatprep.subr.bf16.mxu0 %v3293_v58  ;;  %1003 = vmatprep.subr.bf16.mxu1 %v3295_v16  ;;  %v3327_v58 = vld [vmem:[#allocation5 + $0x368] ss:$16 sps:$4 sm:$0xff]   ;;  %v3329_v16 = vld [vmem:[#allocation5 + $0x384] ss:$16 sps:$4 sm:$0xff]   ;;  %3640 = vst [vmem:[#allocation61_spill] sm:$0xff] %v3331_v61  ;;  %3643 = vst [vmem:[#allocation64_spill] sm:$0xff] %v3341_v8 }
  0x9b   :  { %3638 = vst [vmem:[#allocation59_spill] sm:$0xff] %v3327_v58  ;;  %3639 = vst [vmem:[#allocation60_spill] sm:$0xff] %v3329_v16 }
  0x9d   :  { %918 = vmatpush1.bf16.msra.mxu0 %v3301_v20  ;;  %1004 = vmatpush1.bf16.msra.mxu1 %v3303_v46  ;;  %v3337_v46 = vld [vmem:[#allocation5 + $0x380] ss:$16 sps:$4 sm:$0xff]  }
  0x9e   :  { %919 = vmatprep.subr.bf16.mxu0 %v3305_v7  ;;  %1005 = vmatprep.subr.bf16.mxu1 %v3307_v59  ;;  %3641 = vst [vmem:[#allocation62_spill] sm:$0xff] %v3337_v46  ;;  %v3339_v7 = vld [vmem:[#allocation5 + $0x388] ss:$16 sps:$4 sm:$0xff]   ;;  %v58_v59 = vld [vmem:[#allocation2 + $0x10] sm:$0xff] }
  0x9f   :  { %3642 = vst [vmem:[#allocation63_spill] sm:$0xff] %v3339_v7  ;;  %v62_v20 = vld [vmem:[#allocation2 + $0x30] sm:$0xff] }
  0xa0   :  { %v3357_v60 = vpack.c.bf16 %v62_v20, %v58_v59 }
  0xa1   :  { %920 = vmatpush1.bf16.msra.mxu0 %v3313_v63  ;;  %1006 = vmatpush1.bf16.msra.mxu1 %v3315_v19  ;;  %v3353_v19 = vld [vmem:[#allocation5 + $0x3c4] ss:$16 sps:$4 sm:$0xff]   ;;  %v3355_v63 = vld [vmem:[#allocation5 + $0x3cc] ss:$16 sps:$4 sm:$0xff]  }
  0xa2   :  { %921 = vmatprep.subr.bf16.mxu0 %v3317_v17  ;;  %1007 = vmatprep.subr.bf16.mxu1 %v3319_v18  ;;  %v3349_v17 = vld [vmem:[#allocation5 + $0x3a0] ss:$16 sps:$4 sm:$0xff]   ;;  %v3351_v18 = vld [vmem:[#allocation5 + $0x3a8] ss:$16 sps:$4 sm:$0xff]   ;;  %3645 = vst [vmem:[#allocation66_spill] sm:$0xff] %v3353_v19  ;;  %3646 = vst [vmem:[#allocation67_spill] sm:$0xff] %v3355_v63  ;;  %v70_v47 = vunpack.c.l.bf16 %v3357_v60  ;;  %v74_v55 = vunpack.c.h.bf16 %v3357_v60 }
  0xa3   :  { %3647 = vst [vmem:[#allocation68_spill] sm:$0xff] %v3357_v60 }
  0xa5   :  { %922 = vmatpush1.bf16.msra.mxu0 %v3325_v2  ;;  %1008 = vmatpush1.bf16.msra.mxu1 %v3327_v58  ;;  %v3367_v58 = vld [vmem:[#allocation5 + $0x3e4] ss:$16 sps:$4 sm:$0xff]   ;;  %v3369_v2 = vld [vmem:[#allocation5 + $0x3ec] ss:$16 sps:$4 sm:$0xff]  }
  0xa6   :  { %923 = vmatprep.subr.bf16.mxu0 %v3329_v16  ;;  %1009 = vmatprep.subr.bf16.mxu1 %v3331_v61  ;;  %v3363_v16 = vld [vmem:[#allocation5 + $0x3c0] ss:$16 sps:$4 sm:$0xff]   ;;  %v3365_v61 = vld [vmem:[#allocation5 + $0x3c8] ss:$16 sps:$4 sm:$0xff]  }
  0xa9   :  { %924 = vmatpush1.bf16.msra.mxu0 %v3337_v46  ;;  %1010 = vmatpush1.bf16.msra.mxu1 %v3339_v7  ;;  %v78_v7 = vsub.f32 %v58_v59, %v70_v47  ;;  %v82_v46 = vsub.f32 %v62_v20, %v74_v55  ;;  %v2864_v47 = vld [vmem:[#allocation5] ss:$16 sps:$4 sm:$0xff]   ;;  %v2865_v55 = vld [vmem:[#allocation5 + $0x8] ss:$16 sps:$4 sm:$0xff]   ;;  %v2866_v20 = vld [vmem:[#allocation5 + $0x24] ss:$16 sps:$4 sm:$0xff]  }
  0xaa   :  { %925 = vmatprep.subr.bf16.mxu0 %v3341_v8  ;;  %1011 = vmatprep.subr.bf16.mxu1 %v3343_v56  ;;  %v3377_v56 = vld [vmem:[#allocation5 + $0x3e0] ss:$16 sps:$4 sm:$0xff]   ;;  %v3379_v8 = vld [vmem:[#allocation5 + $0x3e8] ss:$16 sps:$4 sm:$0xff]   ;;  %v2867_v59 = vld [vmem:[#allocation5 + $0x2c] ss:$16 sps:$4 sm:$0xff]  }
  0xab   :  { %3648 = vst [vmem:[#allocation69_spill] sm:$0xff] %v3379_v8  ;;  %v86_v60 = vpack.c.bf16 %v82_v46, %v78_v7  ;;  %v2868_v46 = vld [vmem:[#allocation5 + $0x20] ss:$16 sps:$4 sm:$0xff]   ;;  %v2869_v7 = vld [vmem:[#allocation5 + $0x28] ss:$16 sps:$4 sm:$0xff]  }
  0xad   :  { %926 = vmatpush1.bf16.msra.mxu0 %v3349_v17  ;;  %1012 = vmatpush1.bf16.msra.mxu1 %v3351_v18 }
  0xae   :  { %927 = vmatprep.subr.bf16.mxu0 %v3353_v19  ;;  %1013 = vmatprep.subr.bf16.mxu1 %v3355_v63  ;;  %v2862_v63 = vld [vmem:[#allocation5 + $0x4] ss:$16 sps:$4 sm:$0xff]   ;;  %v2863_v19 = vld [vmem:[#allocation5 + $0xc] ss:$16 sps:$4 sm:$0xff]  }
  0xb1   :  { %928 = vmatpush1.bf16.msra.mxu0 %v3363_v16  ;;  %1014 = vmatpush1.bf16.msra.mxu1 %v3365_v61 }
  0xb2   :  { %929 = vmatprep.subr.bf16.mxu0 %v3367_v58  ;;  %1015 = vmatprep.subr.bf16.mxu1 %v3369_v2 }
  0xb5   :  { %930 = vmatpush1.bf16.msra.mxu0 %v3377_v56  ;;  %1016 = vmatpush1.bf16.msra.mxu1 %v3379_v8  ;;  %v2877_v8 = vld [vmem:[#allocation5 + $0x68] ss:$16 sps:$4 sm:$0xff]  }
  0xb6   :  { %1028 = vmatprep.subr.bf16.mxu0 %v2862_v63  ;;  %1114 = vmatprep.subr.bf16.mxu1 %v2863_v19  ;;  %v2870_v63 = vld [vmem:[#allocation5 + $0x44] ss:$16 sps:$4 sm:$0xff]   ;;  %v2871_v19 = vld [vmem:[#allocation5 + $0x4c] ss:$16 sps:$4 sm:$0xff]  }
  0xb8   :  { %932 = vmatmul.mubr.bf16.vlgmr.msra.gmra.mrb[0].mxu0 %v86_v60  ;;  %1018 = vmatmul.mubr.bf16.vlgmr.msra.gmra.mrb[0].mxu1 %v86_v60  ;;  %v2872_v60 = vld [vmem:[#allocation5 + $0x40] ss:$16 sps:$4 sm:$0xff]  }
  0xb9   :  { %1029 = vmatpush1.bf16.msra.mxu0 %v2864_v47  ;;  %1115 = vmatpush1.bf16.msra.mxu1 %v2865_v55  ;;  %v2873_v47 = vld [vmem:[#allocation5 + $0x48] ss:$16 sps:$4 sm:$0xff]   ;;  %v2874_v55 = vld [vmem:[#allocation5 + $0x64] ss:$16 sps:$4 sm:$0xff]  }
  0xba   :  { %1030 = vmatprep.subr.bf16.mxu0 %v2866_v20  ;;  %1116 = vmatprep.subr.bf16.mxu1 %v2867_v59  ;;  %v2875_v20 = vld [vmem:[#allocation5 + $0x6c] ss:$16 sps:$4 sm:$0xff]   ;;  %v2876_v59 = vld [vmem:[#allocation5 + $0x60] ss:$16 sps:$4 sm:$0xff]  }
  0xbb   :  { %1060 = vmatprep.mubr.bf16.mxu0 %v3127_v50  ;;  %1146 = vmatprep.mubr.bf16.mxu1 %v3127_v50  ;;  %v2878_v50 = vld [vmem:[#allocation5 + $0x84] ss:$16 sps:$4 sm:$0xff]  }
  0xbd   :  { %1031 = vmatpush1.bf16.msra.mxu0 %v2868_v46  ;;  %1117 = vmatpush1.bf16.msra.mxu1 %v2869_v7  ;;  %v2879_v46 = vld [vmem:[#allocation5 + $0x8c] ss:$16 sps:$4 sm:$0xff]   ;;  %v2880_v7 = vld [vmem:[#allocation5 + $0x80] ss:$16 sps:$4 sm:$0xff]  }
  0xbe   :  { %1032 = vmatprep.subr.bf16.mxu0 %v2870_v63  ;;  %1118 = vmatprep.subr.bf16.mxu1 %v2871_v19  ;;  %v2881_v63 = vld [vmem:[#allocation5 + $0x88] ss:$16 sps:$4 sm:$0xff]   ;;  %v2882_v19 = vld [vmem:[#allocation5 + $0xa4] ss:$16 sps:$4 sm:$0xff]  }
  0xc1   :  { %1033 = vmatpush1.bf16.msra.mxu0 %v2872_v60  ;;  %1119 = vmatpush1.bf16.msra.mxu1 %v2873_v47  ;;  %v3697_v60 = vld [vmem:[#allocation61_spill] sm:$0xff]  ;;  %v3698_v47 = vld [vmem:[#allocation62_spill] sm:$0xff] }
  0xc2   :  { %1034 = vmatprep.subr.bf16.mxu0 %v2874_v55  ;;  %1120 = vmatprep.subr.bf16.mxu1 %v2875_v20  ;;  %v3699_v55 = vld [vmem:[#allocation63_spill] sm:$0xff]  ;;  %v3700_v20 = vld [vmem:[#allocation64_spill] sm:$0xff] }
  0xc5   :  { %1035 = vmatpush1.bf16.msra.mxu0 %v2876_v59  ;;  %1121 = vmatpush1.bf16.msra.mxu1 %v2877_v8  ;;  %v3694_v8 = vld [vmem:[#allocation58_spill] sm:$0xff]  ;;  %v3701_v59 = vld [vmem:[#allocation65_spill] sm:$0xff] }
  0xc6   :  { %1036 = vmatprep.subr.bf16.mxu0 %v2878_v50  ;;  %1122 = vmatprep.subr.bf16.mxu1 %v2879_v46  ;;  %v3676_v50 = vld [vmem:[#allocation39_spill] sm:$0xff]  ;;  %v3702_v46 = vld [vmem:[#allocation66_spill] sm:$0xff] }
  0xc9   :  { %1037 = vmatpush1.bf16.msra.mxu0 %v2880_v7  ;;  %1123 = vmatpush1.bf16.msra.mxu1 %v2881_v63  ;;  %v3703_v7 = vld [vmem:[#allocation67_spill] sm:$0xff]  ;;  %v2672_v63 = vld [vmem:[#allocation7 + $0x4] ss:$16 sps:$4 sm:$0xff]  }
  0xca   :  { %1038 = vmatprep.subr.bf16.mxu0 %v2882_v19  ;;  %1124 = vmatprep.subr.bf16.mxu1 %v3050_v21  ;;  %v3649_v21 = vld [vmem:[#allocation14_spill] sm:$0xff]  ;;  %v2675_v19 = vld [vmem:[#allocation7 + $0xc] ss:$16 sps:$4 sm:$0xff]  }
  0xcd   :  { %1039 = vmatpush1.bf16.msra.mxu0 %v3052_v22  ;;  %1125 = vmatpush1.bf16.msra.mxu1 %v3054_v23  ;;  %v3650_v22 = vld [vmem:[#allocation13_spill] sm:$0xff]  ;;  %v3651_v23 = vld [vmem:[#allocation15_spill] sm:$0xff] }
  0xce   :  { %1040 = vmatprep.subr.bf16.mxu0 %v3056_v24  ;;  %1126 = vmatprep.subr.bf16.mxu1 %v3059_v25  ;;  %v3652_v24 = vld [vmem:[#allocation16_spill] sm:$0xff]  ;;  %v3653_v25 = vld [vmem:[#allocation17_spill] sm:$0xff] }
  0xd1   :  { %1041 = vmatpush1.bf16.msra.mxu0 %v3061_v26  ;;  %1127 = vmatpush1.bf16.msra.mxu1 %v3063_v27  ;;  %v3654_v26 = vld [vmem:[#allocation18_spill] sm:$0xff]  ;;  %v3655_v27 = vld [vmem:[#allocation41_spill] sm:$0xff] }
  0xd2   :  { %1042 = vmatprep.subr.bf16.mxu0 %v3067_v28  ;;  %1128 = vmatprep.subr.bf16.mxu1 %v3071_v29  ;;  %v3656_v28 = vld [vmem:[#allocation19_spill] sm:$0xff]  ;;  %v3657_v29 = vld [vmem:[#allocation20_spill] sm:$0xff] }
  0xd5   :  { %1043 = vmatpush1.bf16.msra.mxu0 %v3073_v30  ;;  %1129 = vmatpush1.bf16.msra.mxu1 %v3077_v31  ;;  %v3658_v30 = vld [vmem:[#allocation21_spill] sm:$0xff]  ;;  %v3659_v31 = vld [vmem:[#allocation22_spill] sm:$0xff] }
  0xd6   :  { %1044 = vmatprep.subr.bf16.mxu0 %v3079_v32  ;;  %1130 = vmatprep.subr.bf16.mxu1 %v3083_v33  ;;  %v3660_v32 = vld [vmem:[#allocation23_spill] sm:$0xff]  ;;  %v3661_v33 = vld [vmem:[#allocation24_spill] sm:$0xff] }
  0xd9   :  { %1045 = vmatpush1.bf16.msra.mxu0 %v3085_v34  ;;  %1131 = vmatpush1.bf16.msra.mxu1 %v3087_v35  ;;  %v3662_v34 = vld [vmem:[#allocation25_spill] sm:$0xff]  ;;  %v3663_v35 = vld [vmem:[#allocation26_spill] sm:$0xff] }
  0xda   :  { %1046 = vmatprep.subr.bf16.mxu0 %v3091_v36  ;;  %1132 = vmatprep.subr.bf16.mxu1 %v3095_v37  ;;  %v3664_v36 = vld [vmem:[#allocation27_spill] sm:$0xff]  ;;  %v3665_v37 = vld [vmem:[#allocation28_spill] sm:$0xff] }
  0xdd   :  { %1047 = vmatpush1.bf16.msra.mxu0 %v3097_v38  ;;  %1133 = vmatpush1.bf16.msra.mxu1 %v3101_v39  ;;  %v3666_v38 = vld [vmem:[#allocation29_spill] sm:$0xff]  ;;  %v3667_v39 = vld [vmem:[#allocation30_spill] sm:$0xff] }
  0xde   :  { %1048 = vmatprep.subr.bf16.mxu0 %v3103_v40  ;;  %1134 = vmatprep.subr.bf16.mxu1 %v3107_v41  ;;  %v3668_v40 = vld [vmem:[#allocation31_spill] sm:$0xff]  ;;  %v3669_v41 = vld [vmem:[#allocation32_spill] sm:$0xff] }
  0xe1   :  { %1049 = vmatpush1.bf16.msra.mxu0 %v3109_v42  ;;  %1135 = vmatpush1.bf16.msra.mxu1 %v3111_v43  ;;  %v3670_v42 = vld [vmem:[#allocation33_spill] sm:$0xff]  ;;  %v3671_v43 = vld [vmem:[#allocation34_spill] sm:$0xff] }
  0xe2   :  { %1050 = vmatprep.subr.bf16.mxu0 %v3115_v44  ;;  %1136 = vmatprep.subr.bf16.mxu1 %v3119_v45  ;;  %v3672_v44 = vld [vmem:[#allocation35_spill] sm:$0xff]  ;;  %v3673_v45 = vld [vmem:[#allocation36_spill] sm:$0xff] }
  0xe5   :  { %1051 = vmatpush1.bf16.msra.mxu0 %v3123_v48  ;;  %1137 = vmatpush1.bf16.msra.mxu1 %v3125_v49  ;;  %v3674_v48 = vld [vmem:[#allocation37_spill] sm:$0xff]  ;;  %v3675_v49 = vld [vmem:[#allocation38_spill] sm:$0xff] }
  0xe6   :  { %1052 = vmatprep.subr.bf16.mxu0 %v3131_v51  ;;  %1138 = vmatprep.subr.bf16.mxu1 %v3133_v52  ;;  %v3677_v51 = vld [vmem:[#allocation40_spill] sm:$0xff]  ;;  %v3678_v52 = vld [vmem:[#allocation42_spill] sm:$0xff] }
  0xe9   :  { %1053 = vmatpush1.bf16.msra.mxu0 %v3135_v53  ;;  %1139 = vmatpush1.bf16.msra.mxu1 %v3137_v54  ;;  %v3679_v53 = vld [vmem:[#allocation43_spill] sm:$0xff]  ;;  %v3680_v54 = vld [vmem:[#allocation44_spill] sm:$0xff] }
  0xea   :  { %1054 = vmatprep.subr.bf16.mxu0 %v3141_v57  ;;  %1140 = vmatprep.subr.bf16.mxu1 %v3147_v62  ;;  %v3681_v57 = vld [vmem:[#allocation45_spill] sm:$0xff]  ;;  %v3682_v62 = vld [vmem:[#allocation46_spill] sm:$0xff] }
  0xed   :  { %1055 = vmatpush1.bf16.msra.mxu0 %v3149_v0  ;;  %1141 = vmatpush1.bf16.msra.mxu1 %v3151_v1  ;;  %v3683_v0 = vld [vmem:[#allocation47_spill] sm:$0xff]  ;;  %v3684_v1 = vld [vmem:[#allocation48_spill] sm:$0xff] }
  0xee   :  { %1056 = vmatprep.subr.bf16.mxu0 %v3157_v3  ;;  %1142 = vmatprep.subr.bf16.mxu1 %v3161_v4  ;;  %v3685_v3 = vld [vmem:[#allocation49_spill] sm:$0xff]  ;;  %v3686_v4 = vld [vmem:[#allocation50_spill] sm:$0xff] }
  0xf1   :  { %1057 = vmatpush1.bf16.msra.mxu0 %v3163_v5  ;;  %1143 = vmatpush1.bf16.msra.mxu1 %v3165_v6  ;;  %v3687_v5 = vld [vmem:[#allocation51_spill] sm:$0xff]  ;;  %v3688_v6 = vld [vmem:[#allocation52_spill] sm:$0xff] }
  0xf2   :  { %1058 = vmatprep.subr.bf16.mxu0 %v3171_v9  ;;  %1144 = vmatprep.subr.bf16.mxu1 %v3175_v10  ;;  %v3689_v9 = vld [vmem:[#allocation53_spill] sm:$0xff]  ;;  %v3690_v10 = vld [vmem:[#allocation54_spill] sm:$0xff] }
  0xf5   :  { %1059 = vmatpush1.bf16.msra.mxu0 %v3177_v11  ;;  %1145 = vmatpush1.bf16.msra.mxu1 %v3179_v12  ;;  %v3691_v11 = vld [vmem:[#allocation55_spill] sm:$0xff]  ;;  %v3692_v12 = vld [vmem:[#allocation56_spill] sm:$0xff] }
  0xf6   :  { %1071 = vmatprep.subr.bf16.mxu0 %v3183_v15  ;;  %1157 = vmatprep.subr.bf16.mxu1 %v3649_v21  ;;  %v3693_v15 = vld [vmem:[#allocation57_spill] sm:$0xff] }
  0xf7   :  { %v3704_v21 = vld [vmem:[#allocation69_spill] sm:$0xff] }
  0xf8   :  { %1061 = vmatmul.mubr.bf16.vlgmr.msra.gmra.mrb[0].mxu0 %v3650_v22  ;;  %1147 = vmatmul.mubr.bf16.vlgmr.msra.gmra.mrb[0].mxu1 %v3650_v22 }
  0xf9   :  { %1072 = vmatpush1.bf16.msra.mxu0 %v3651_v23  ;;  %1158 = vmatpush1.bf16.msra.mxu1 %v3652_v24  ;;  %v2678_v23 = vld [vmem:[#allocation7 + $0x24] ss:$16 sps:$4 sm:$0xff]   ;;  %v2681_v24 = vld [vmem:[#allocation7 + $0x2c] ss:$16 sps:$4 sm:$0xff]  }
  0xfa   :  { %1073 = vmatprep.subr.bf16.mxu0 %v3653_v25  ;;  %1159 = vmatprep.subr.bf16.mxu1 %v3654_v26  ;;  %v3705_v25 = vld [vmem:[#allocation68_spill] sm:$0xff] }
  0xfb   :  { %1103 = vmatprep.mubr.bf16.mxu0 %v3655_v27  ;;  %1189 = vmatprep.mubr.bf16.mxu1 %v3655_v27  ;;  %v2682_v26 = vld [vmem:[#allocation7 + $0x40] ss:$16 sps:$4 sm:$0xff]  }
  0xfd   :  { %1074 = vmatpush1.bf16.msra.mxu0 %v3656_v28  ;;  %1160 = vmatpush1.bf16.msra.mxu1 %v3657_v29  ;;  %v2685_v28 = vld [vmem:[#allocation7 + $0x48] ss:$16 sps:$4 sm:$0xff]   ;;  %v2690_v29 = vld [vmem:[#allocation7 + $0x64] ss:$16 sps:$4 sm:$0xff]  }
  0xfe   :  { %1075 = vmatprep.subr.bf16.mxu0 %v3658_v30  ;;  %1161 = vmatprep.subr.bf16.mxu1 %v3659_v31  ;;  %v2693_v30 = vld [vmem:[#allocation7 + $0x6c] ss:$16 sps:$4 sm:$0xff]   ;;  %v2688_v31 = vld [vmem:[#allocation7 + $0x60] ss:$16 sps:$4 sm:$0xff]  }
 0x101   :  { %1076 = vmatpush1.bf16.msra.mxu0 %v3660_v32  ;;  %1162 = vmatpush1.bf16.msra.mxu1 %v3661_v33  ;;  %v2691_v32 = vld [vmem:[#allocation7 + $0x68] ss:$16 sps:$4 sm:$0xff]   ;;  %v2696_v33 = vld [vmem:[#allocation7 + $0x84] ss:$16 sps:$4 sm:$0xff]  }
 0x102   :  { %1077 = vmatprep.subr.bf16.mxu0 %v3662_v34  ;;  %1163 = vmatprep.subr.bf16.mxu1 %v3663_v35  ;;  %v2699_v34 = vld [vmem:[#allocation7 + $0x8c] ss:$16 sps:$4 sm:$0xff]   ;;  %v2694_v35 = vld [vmem:[#allocation7 + $0x80] ss:$16 sps:$4 sm:$0xff]  }
 0x105   :  { %1078 = vmatpush1.bf16.msra.mxu0 %v3664_v36  ;;  %1164 = vmatpush1.bf16.msra.mxu1 %v3665_v37  ;;  %v2697_v36 = vld [vmem:[#allocation7 + $0x88] ss:$16 sps:$4 sm:$0xff]   ;;  %v2702_v37 = vld [vmem:[#allocation7 + $0xa4] ss:$16 sps:$4 sm:$0xff]  }
 0x106   :  { %1079 = vmatprep.subr.bf16.mxu0 %v3666_v38  ;;  %1165 = vmatprep.subr.bf16.mxu1 %v3667_v39  ;;  %v2705_v38 = vld [vmem:[#allocation7 + $0xac] ss:$16 sps:$4 sm:$0xff]   ;;  %v2700_v39 = vld [vmem:[#allocation7 + $0xa0] ss:$16 sps:$4 sm:$0xff]  }
 0x109   :  { %1080 = vmatpush1.bf16.msra.mxu0 %v3668_v40  ;;  %1166 = vmatpush1.bf16.msra.mxu1 %v3669_v41  ;;  %v2703_v40 = vld [vmem:[#allocation7 + $0xa8] ss:$16 sps:$4 sm:$0xff]   ;;  %v2708_v41 = vld [vmem:[#allocation7 + $0xc4] ss:$16 sps:$4 sm:$0xff]  }
 0x10a   :  { %1081 = vmatprep.subr.bf16.mxu0 %v3670_v42  ;;  %1167 = vmatprep.subr.bf16.mxu1 %v3671_v43  ;;  %v2711_v42 = vld [vmem:[#allocation7 + $0xcc] ss:$16 sps:$4 sm:$0xff]   ;;  %v2706_v43 = vld [vmem:[#allocation7 + $0xc0] ss:$16 sps:$4 sm:$0xff]  }
 0x10d   :  { %1082 = vmatpush1.bf16.msra.mxu0 %v3672_v44  ;;  %1168 = vmatpush1.bf16.msra.mxu1 %v3673_v45  ;;  %v2709_v44 = vld [vmem:[#allocation7 + $0xc8] ss:$16 sps:$4 sm:$0xff]   ;;  %v2714_v45 = vld [vmem:[#allocation7 + $0xe4] ss:$16 sps:$4 sm:$0xff]  }
 0x10e   :  { %1083 = vmatprep.subr.bf16.mxu0 %v3674_v48  ;;  %1169 = vmatprep.subr.bf16.mxu1 %v3675_v49  ;;  %v2717_v48 = vld [vmem:[#allocation7 + $0xec] ss:$16 sps:$4 sm:$0xff]   ;;  %v2712_v49 = vld [vmem:[#allocation7 + $0xe0] ss:$16 sps:$4 sm:$0xff]  }
 0x111   :  { %1084 = vmatpush1.bf16.msra.mxu0 %v3261_v13  ;;  %1170 = vmatpush1.bf16.msra.mxu1 %v3263_v14  ;;  %v3695_v13 = vld [vmem:[#allocation59_spill] sm:$0xff]  ;;  %v3696_v14 = vld [vmem:[#allocation60_spill] sm:$0xff] }
 0x112   :  { %1085 = vmatprep.subr.bf16.mxu0 %v3676_v50  ;;  %1171 = vmatprep.subr.bf16.mxu1 %v3677_v51  ;;  %v2715_v50 = vld [vmem:[#allocation7 + $0xe8] ss:$16 sps:$4 sm:$0xff]   ;;  %v2720_v51 = vld [vmem:[#allocation7 + $0x104] ss:$16 sps:$4 sm:$0xff]  }
 0x115   :  { %1086 = vmatpush1.bf16.msra.mxu0 %v3678_v52  ;;  %1172 = vmatpush1.bf16.msra.mxu1 %v3679_v53  ;;  %v2723_v52 = vld [vmem:[#allocation7 + $0x10c] ss:$16 sps:$4 sm:$0xff]   ;;  %v2718_v53 = vld [vmem:[#allocation7 + $0x100] ss:$16 sps:$4 sm:$0xff]  }
 0x116   :  { %1087 = vmatprep.subr.bf16.mxu0 %v3680_v54  ;;  %1173 = vmatprep.subr.bf16.mxu1 %v3681_v57  ;;  %v2721_v54 = vld [vmem:[#allocation7 + $0x108] ss:$16 sps:$4 sm:$0xff]   ;;  %v2726_v57 = vld [vmem:[#allocation7 + $0x124] ss:$16 sps:$4 sm:$0xff]  }
 0x119   :  { %1088 = vmatpush1.bf16.msra.mxu0 %v3682_v62  ;;  %1174 = vmatpush1.bf16.msra.mxu1 %v3683_v0  ;;  %v2729_v62 = vld [vmem:[#allocation7 + $0x12c] ss:$16 sps:$4 sm:$0xff]   ;;  %v2724_v0 = vld [vmem:[#allocation7 + $0x120] ss:$16 sps:$4 sm:$0xff]  }
 0x11a   :  { %1089 = vmatprep.subr.bf16.mxu0 %v3684_v1  ;;  %1175 = vmatprep.subr.bf16.mxu1 %v3685_v3  ;;  %v2727_v1 = vld [vmem:[#allocation7 + $0x128] ss:$16 sps:$4 sm:$0xff]   ;;  %v2732_v3 = vld [vmem:[#allocation7 + $0x144] ss:$16 sps:$4 sm:$0xff]  }
 0x11d   :  { %1090 = vmatpush1.bf16.msra.mxu0 %v3686_v4  ;;  %1176 = vmatpush1.bf16.msra.mxu1 %v3687_v5  ;;  %v2735_v4 = vld [vmem:[#allocation7 + $0x14c] ss:$16 sps:$4 sm:$0xff]   ;;  %v2730_v5 = vld [vmem:[#allocation7 + $0x140] ss:$16 sps:$4 sm:$0xff]  }
 0x11e   :  { %1091 = vmatprep.subr.bf16.mxu0 %v3688_v6  ;;  %1177 = vmatprep.subr.bf16.mxu1 %v3689_v9  ;;  %v2733_v6 = vld [vmem:[#allocation7 + $0x148] ss:$16 sps:$4 sm:$0xff]   ;;  %v2738_v9 = vld [vmem:[#allocation7 + $0x164] ss:$16 sps:$4 sm:$0xff]  }
 0x121   :  { %1092 = vmatpush1.bf16.msra.mxu0 %v3690_v10  ;;  %1178 = vmatpush1.bf16.msra.mxu1 %v3691_v11  ;;  %v2741_v10 = vld [vmem:[#allocation7 + $0x16c] ss:$16 sps:$4 sm:$0xff]   ;;  %v2736_v11 = vld [vmem:[#allocation7 + $0x160] ss:$16 sps:$4 sm:$0xff]  }
 0x122   :  { %1093 = vmatprep.subr.bf16.mxu0 %v3692_v12  ;;  %1179 = vmatprep.subr.bf16.mxu1 %v3693_v15  ;;  %v2739_v12 = vld [vmem:[#allocation7 + $0x168] ss:$16 sps:$4 sm:$0xff]   ;;  %v2744_v15 = vld [vmem:[#allocation7 + $0x184] ss:$16 sps:$4 sm:$0xff]  }
 0x125   :  { %1094 = vmatpush1.bf16.msra.mxu0 %v3694_v8  ;;  %1180 = vmatpush1.bf16.msra.mxu1 %v3695_v13  ;;  %v2747_v8 = vld [vmem:[#allocation7 + $0x18c] ss:$16 sps:$4 sm:$0xff]   ;;  %v2742_v13 = vld [vmem:[#allocation7 + $0x180] ss:$16 sps:$4 sm:$0xff]  }
 0x126   :  { %1095 = vmatprep.subr.bf16.mxu0 %v3696_v14  ;;  %1181 = vmatprep.subr.bf16.mxu1 %v3697_v60  ;;  %v2745_v14 = vld [vmem:[#allocation7 + $0x188] ss:$16 sps:$4 sm:$0xff]   ;;  %v2750_v60 = vld [vmem:[#allocation7 + $0x1a4] ss:$16 sps:$4 sm:$0xff]  }
 0x129   :  { %1096 = vmatpush1.bf16.msra.mxu0 %v3698_v47  ;;  %1182 = vmatpush1.bf16.msra.mxu1 %v3699_v55  ;;  %v2753_v47 = vld [vmem:[#allocation7 + $0x1ac] ss:$16 sps:$4 sm:$0xff]   ;;  %v2748_v55 = vld [vmem:[#allocation7 + $0x1a0] ss:$16 sps:$4 sm:$0xff]  }
 0x12a   :  { %1097 = vmatprep.subr.bf16.mxu0 %v3700_v20  ;;  %1183 = vmatprep.subr.bf16.mxu1 %v3701_v59  ;;  %v2751_v20 = vld [vmem:[#allocation7 + $0x1a8] ss:$16 sps:$4 sm:$0xff]   ;;  %v2756_v59 = vld [vmem:[#allocation7 + $0x1c4] ss:$16 sps:$4 sm:$0xff]  }
 0x12d   :  { %1098 = vmatpush1.bf16.msra.mxu0 %v3349_v17  ;;  %1184 = vmatpush1.bf16.msra.mxu1 %v3351_v18  ;;  %v2670_v17 = vld [vmem:[#allocation7] ss:$16 sps:$4 sm:$0xff]   ;;  %v2673_v18 = vld [vmem:[#allocation7 + $0x8] ss:$16 sps:$4 sm:$0xff]  }
 0x12e   :  { %1099 = vmatprep.subr.bf16.mxu0 %v3702_v46  ;;  %1185 = vmatprep.subr.bf16.mxu1 %v3703_v7  ;;  %v2759_v46 = vld [vmem:[#allocation7 + $0x1cc] ss:$16 sps:$4 sm:$0xff]   ;;  %v2754_v7 = vld [vmem:[#allocation7 + $0x1c0] ss:$16 sps:$4 sm:$0xff]  }
 0x131   :  { %1100 = vmatpush1.bf16.msra.mxu0 %v3363_v16  ;;  %1186 = vmatpush1.bf16.msra.mxu1 %v3365_v61  ;;  %v2676_v16 = vld [vmem:[#allocation7 + $0x20] ss:$16 sps:$4 sm:$0xff]   ;;  %v2684_v61 = vld [vmem:[#allocation7 + $0x44] ss:$16 sps:$4 sm:$0xff]  }
 0x132   :  { %1101 = vmatprep.subr.bf16.mxu0 %v3367_v58  ;;  %1187 = vmatprep.subr.bf16.mxu1 %v3369_v2  ;;  %v2679_v58 = vld [vmem:[#allocation7 + $0x28] ss:$16 sps:$4 sm:$0xff]   ;;  %v3706_v2 = vld [vmem:[#allocation12_spill] sm:$0xff] }
 0x135   :  { %1102 = vmatpush1.bf16.msra.mxu0 %v3377_v56  ;;  %1188 = vmatpush1.bf16.msra.mxu1 %v3704_v21  ;;  %v2687_v56 = vld [vmem:[#allocation7 + $0x4c] ss:$16 sps:$4 sm:$0xff]  }
 0x136   :  { %1968 = vmatprep.subr.bf16.mxu0 %v2672_v63  ;;  %2054 = vmatprep.subr.bf16.mxu1 %v2675_v19  ;;  %v2757_v63 = vld [vmem:[#allocation7 + $0x1c8] ss:$16 sps:$4 sm:$0xff]   ;;  %v2762_v19 = vld [vmem:[#allocation7 + $0x1e4] ss:$16 sps:$4 sm:$0xff]   ;;  %v2765_v21 = vld [vmem:[#allocation7 + $0x1ec] ss:$16 sps:$4 sm:$0xff]  }
 0x138   :  { %1104 = vmatmul.mubr.bf16.vlgmr.msra.gmra.mrb[0].mxu0 %v3705_v25  ;;  %1190 = vmatmul.mubr.bf16.vlgmr.msra.gmra.mrb[0].mxu1 %v3705_v25 }
 0x139   :  { %1969 = vmatpush1.bf16.msra.mxu0 %v2670_v17  ;;  %2055 = vmatpush1.bf16.msra.mxu1 %v2673_v18  ;;  %v2760_v17 = vld [vmem:[#allocation7 + $0x1e0] ss:$16 sps:$4 sm:$0xff]   ;;  %v2763_v18 = vld [vmem:[#allocation7 + $0x1e8] ss:$16 sps:$4 sm:$0xff]  }
 0x13a   :  { %1970 = vmatprep.subr.bf16.mxu0 %v2678_v23  ;;  %2056 = vmatprep.subr.bf16.mxu1 %v2681_v24  ;;  %v2768_v23 = vld [vmem:[#allocation7 + $0x204] ss:$16 sps:$4 sm:$0xff]   ;;  %v2771_v24 = vld [vmem:[#allocation7 + $0x20c] ss:$16 sps:$4 sm:$0xff]  }
 0x13b   :  { %2000 = vmatprep.mubr.bf16.mxu0 %v3706_v2  ;;  %2086 = vmatprep.mubr.bf16.mxu1 %v3706_v2  ;;  %v2772_v2 = vld [vmem:[#allocation7 + $0x220] ss:$16 sps:$4 sm:$0xff]  }
 0x13d   :  { %1971 = vmatpush1.bf16.msra.mxu0 %v2676_v16  ;;  %2057 = vmatpush1.bf16.msra.mxu1 %v2679_v58  ;;  %v2766_v16 = vld [vmem:[#allocation7 + $0x200] ss:$16 sps:$4 sm:$0xff]   ;;  %v2769_v58 = vld [vmem:[#allocation7 + $0x208] ss:$16 sps:$4 sm:$0xff]  }
 0x13e   :  { %1972 = vmatprep.subr.bf16.mxu0 %v2684_v61  ;;  %2058 = vmatprep.subr.bf16.mxu1 %v2687_v56  ;;  %v2774_v61 = vld [vmem:[#allocation7 + $0x224] ss:$16 sps:$4 sm:$0xff]   ;;  %v2777_v56 = vld [vmem:[#allocation7 + $0x22c] ss:$16 sps:$4 sm:$0xff]  }
 0x141   :  { %1973 = vmatpush1.bf16.msra.mxu0 %v2682_v26  ;;  %2059 = vmatpush1.bf16.msra.mxu1 %v2685_v28  ;;  %v2775_v26 = vld [vmem:[#allocation7 + $0x228] ss:$16 sps:$4 sm:$0xff]   ;;  %v2780_v28 = vld [vmem:[#allocation7 + $0x244] ss:$16 sps:$4 sm:$0xff]  }
 0x142   :  { %1974 = vmatprep.subr.bf16.mxu0 %v2690_v29  ;;  %2060 = vmatprep.subr.bf16.mxu1 %v2693_v30  ;;  %v2783_v29 = vld [vmem:[#allocation7 + $0x24c] ss:$16 sps:$4 sm:$0xff]   ;;  %v2778_v30 = vld [vmem:[#allocation7 + $0x240] ss:$16 sps:$4 sm:$0xff]  }
 0x145   :  { %1975 = vmatpush1.bf16.msra.mxu0 %v2688_v31  ;;  %2061 = vmatpush1.bf16.msra.mxu1 %v2691_v32  ;;  %v2781_v31 = vld [vmem:[#allocation7 + $0x248] ss:$16 sps:$4 sm:$0xff]   ;;  %v2786_v32 = vld [vmem:[#allocation7 + $0x264] ss:$16 sps:$4 sm:$0xff]  }
 0x146   :  { %1976 = vmatprep.subr.bf16.mxu0 %v2696_v33  ;;  %2062 = vmatprep.subr.bf16.mxu1 %v2699_v34  ;;  %v2784_v33 = vld [vmem:[#allocation7 + $0x260] ss:$16 sps:$4 sm:$0xff]   ;;  %v2787_v34 = vld [vmem:[#allocation7 + $0x268] ss:$16 sps:$4 sm:$0xff]  }
 0x149   :  { %1977 = vmatpush1.bf16.msra.mxu0 %v2694_v35  ;;  %2063 = vmatpush1.bf16.msra.mxu1 %v2697_v36  ;;  %v2792_v35 = vld [vmem:[#allocation7 + $0x284] ss:$16 sps:$4 sm:$0xff]   ;;  %v2795_v36 = vld [vmem:[#allocation7 + $0x28c] ss:$16 sps:$4 sm:$0xff]  }
 0x14a   :  { %1978 = vmatprep.subr.bf16.mxu0 %v2702_v37  ;;  %2064 = vmatprep.subr.bf16.mxu1 %v2705_v38  ;;  %v2790_v37 = vld [vmem:[#allocation7 + $0x280] ss:$16 sps:$4 sm:$0xff]   ;;  %v2798_v38 = vld [vmem:[#allocation7 + $0x2a4] ss:$16 sps:$4 sm:$0xff]  }
 0x14d   :  { %1979 = vmatpush1.bf16.msra.mxu0 %v2700_v39  ;;  %2065 = vmatpush1.bf16.msra.mxu1 %v2703_v40  ;;  %v2801_v39 = vld [vmem:[#allocation7 + $0x2ac] ss:$16 sps:$4 sm:$0xff]   ;;  %v2796_v40 = vld [vmem:[#allocation7 + $0x2a0] ss:$16 sps:$4 sm:$0xff]  }
 0x14e   :  { %1980 = vmatprep.subr.bf16.mxu0 %v2708_v41  ;;  %2066 = vmatprep.subr.bf16.mxu1 %v2711_v42  ;;  %v2799_v41 = vld [vmem:[#allocation7 + $0x2a8] ss:$16 sps:$4 sm:$0xff]   ;;  %v2804_v42 = vld [vmem:[#allocation7 + $0x2c4] ss:$16 sps:$4 sm:$0xff]  }
 0x151   :  { %1981 = vmatpush1.bf16.msra.mxu0 %v2706_v43  ;;  %2067 = vmatpush1.bf16.msra.mxu1 %v2709_v44  ;;  %v2807_v43 = vld [vmem:[#allocation7 + $0x2cc] ss:$16 sps:$4 sm:$0xff]   ;;  %v2802_v44 = vld [vmem:[#allocation7 + $0x2c0] ss:$16 sps:$4 sm:$0xff]  }
 0x152   :  { %1982 = vmatprep.subr.bf16.mxu0 %v2714_v45  ;;  %2068 = vmatprep.subr.bf16.mxu1 %v2717_v48  ;;  %v2805_v45 = vld [vmem:[#allocation7 + $0x2c8] ss:$16 sps:$4 sm:$0xff]   ;;  %v2810_v48 = vld [vmem:[#allocation7 + $0x2e4] ss:$16 sps:$4 sm:$0xff]  }
 0x155   :  { %1983 = vmatpush1.bf16.msra.mxu0 %v2712_v49  ;;  %2069 = vmatpush1.bf16.msra.mxu1 %v2715_v50  ;;  %v2813_v49 = vld [vmem:[#allocation7 + $0x2ec] ss:$16 sps:$4 sm:$0xff]   ;;  %v2808_v50 = vld [vmem:[#allocation7 + $0x2e0] ss:$16 sps:$4 sm:$0xff]  }
 0x156   :  { %1984 = vmatprep.subr.bf16.mxu0 %v2720_v51  ;;  %2070 = vmatprep.subr.bf16.mxu1 %v2723_v52  ;;  %v2811_v51 = vld [vmem:[#allocation7 + $0x2e8] ss:$16 sps:$4 sm:$0xff]   ;;  %v2816_v52 = vld [vmem:[#allocation7 + $0x304] ss:$16 sps:$4 sm:$0xff]  }
 0x159   :  { %1985 = vmatpush1.bf16.msra.mxu0 %v2718_v53  ;;  %2071 = vmatpush1.bf16.msra.mxu1 %v2721_v54  ;;  %v2819_v53 = vld [vmem:[#allocation7 + $0x30c] ss:$16 sps:$4 sm:$0xff]   ;;  %v2814_v54 = vld [vmem:[#allocation7 + $0x300] ss:$16 sps:$4 sm:$0xff]  }
 0x15a   :  { %1986 = vmatprep.subr.bf16.mxu0 %v2726_v57  ;;  %2072 = vmatprep.subr.bf16.mxu1 %v2729_v62  ;;  %v2817_v57 = vld [vmem:[#allocation7 + $0x308] ss:$16 sps:$4 sm:$0xff]   ;;  %v2822_v62 = vld [vmem:[#allocation7 + $0x324] ss:$16 sps:$4 sm:$0xff]  }
 0x15d   :  { %1987 = vmatpush1.bf16.msra.mxu0 %v2724_v0  ;;  %2073 = vmatpush1.bf16.msra.mxu1 %v2727_v1  ;;  %v2825_v0 = vld [vmem:[#allocation7 + $0x32c] ss:$16 sps:$4 sm:$0xff]   ;;  %v2820_v1 = vld [vmem:[#allocation7 + $0x320] ss:$16 sps:$4 sm:$0xff]  }
 0x15e   :  { %1988 = vmatprep.subr.bf16.mxu0 %v2732_v3  ;;  %2074 = vmatprep.subr.bf16.mxu1 %v2735_v4  ;;  %v2823_v3 = vld [vmem:[#allocation7 + $0x328] ss:$16 sps:$4 sm:$0xff]   ;;  %v2828_v4 = vld [vmem:[#allocation7 + $0x344] ss:$16 sps:$4 sm:$0xff]  }
 0x161   :  { %1989 = vmatpush1.bf16.msra.mxu0 %v2730_v5  ;;  %2075 = vmatpush1.bf16.msra.mxu1 %v2733_v6  ;;  %v2831_v5 = vld [vmem:[#allocation7 + $0x34c] ss:$16 sps:$4 sm:$0xff]   ;;  %v2826_v6 = vld [vmem:[#allocation7 + $0x340] ss:$16 sps:$4 sm:$0xff]  }
 0x162   :  { %1990 = vmatprep.subr.bf16.mxu0 %v2738_v9  ;;  %2076 = vmatprep.subr.bf16.mxu1 %v2741_v10  ;;  %v2829_v9 = vld [vmem:[#allocation7 + $0x348] ss:$16 sps:$4 sm:$0xff]   ;;  %v2834_v10 = vld [vmem:[#allocation7 + $0x364] ss:$16 sps:$4 sm:$0xff]  }
 0x165   :  { %1991 = vmatpush1.bf16.msra.mxu0 %v2736_v11  ;;  %2077 = vmatpush1.bf16.msra.mxu1 %v2739_v12  ;;  %v2837_v11 = vld [vmem:[#allocation7 + $0x36c] ss:$16 sps:$4 sm:$0xff]   ;;  %v2832_v12 = vld [vmem:[#allocation7 + $0x360] ss:$16 sps:$4 sm:$0xff]  }
 0x166   :  { %1992 = vmatprep.subr.bf16.mxu0 %v2744_v15  ;;  %2078 = vmatprep.subr.bf16.mxu1 %v2747_v8  ;;  %v2835_v15 = vld [vmem:[#allocation7 + $0x368] ss:$16 sps:$4 sm:$0xff]   ;;  %v2840_v8 = vld [vmem:[#allocation7 + $0x384] ss:$16 sps:$4 sm:$0xff]  }
 0x169   :  { %1993 = vmatpush1.bf16.msra.mxu0 %v2742_v13  ;;  %2079 = vmatpush1.bf16.msra.mxu1 %v2745_v14  ;;  %v2843_v13 = vld [vmem:[#allocation7 + $0x38c] ss:$16 sps:$4 sm:$0xff]   ;;  %v2838_v14 = vld [vmem:[#allocation7 + $0x380] ss:$16 sps:$4 sm:$0xff]  }
 0x16a   :  { %1994 = vmatprep.subr.bf16.mxu0 %v2750_v60  ;;  %2080 = vmatprep.subr.bf16.mxu1 %v2753_v47  ;;  %v2841_v60 = vld [vmem:[#allocation7 + $0x388] ss:$16 sps:$4 sm:$0xff]   ;;  %v2846_v47 = vld [vmem:[#allocation7 + $0x3a4] ss:$16 sps:$4 sm:$0xff]  }
 0x16d   :  { %1995 = vmatpush1.bf16.msra.mxu0 %v2748_v55  ;;  %2081 = vmatpush1.bf16.msra.mxu1 %v2751_v20  ;;  %v2849_v55 = vld [vmem:[#allocation7 + $0x3ac] ss:$16 sps:$4 sm:$0xff]   ;;  %v2844_v20 = vld [vmem:[#allocation7 + $0x3a0] ss:$16 sps:$4 sm:$0xff]  }
 0x16e   :  { %1996 = vmatprep.subr.bf16.mxu0 %v2756_v59  ;;  %2082 = vmatprep.subr.bf16.mxu1 %v2759_v46  ;;  %v2847_v59 = vld [vmem:[#allocation7 + $0x3a8] ss:$16 sps:$4 sm:$0xff]   ;;  %v2852_v46 = vld [vmem:[#allocation7 + $0x3c4] ss:$16 sps:$4 sm:$0xff]  }
 0x171   :  { %1997 = vmatpush1.bf16.msra.mxu0 %v2754_v7  ;;  %2083 = vmatpush1.bf16.msra.mxu1 %v2757_v63  ;;  %v2855_v7 = vld [vmem:[#allocation7 + $0x3cc] ss:$16 sps:$4 sm:$0xff]   ;;  %v2850_v63 = vld [vmem:[#allocation7 + $0x3c0] ss:$16 sps:$4 sm:$0xff]  }
 0x172   :  { %1998 = vmatprep.subr.bf16.mxu0 %v2762_v19  ;;  %2084 = vmatprep.subr.bf16.mxu1 %v2765_v21  ;;  %v2853_v19 = vld [vmem:[#allocation7 + $0x3c8] ss:$16 sps:$4 sm:$0xff]   ;;  %v2858_v21 = vld [vmem:[#allocation7 + $0x3e4] ss:$16 sps:$4 sm:$0xff]  }
 0x175   :  { %1999 = vmatpush1.bf16.msra.mxu0 %v2760_v17  ;;  %2085 = vmatpush1.bf16.msra.mxu1 %v2763_v18  ;;  %v2861_v17 = vld [vmem:[#allocation7 + $0x3ec] ss:$16 sps:$4 sm:$0xff]   ;;  %v2856_v18 = vld [vmem:[#allocation7 + $0x3e0] ss:$16 sps:$4 sm:$0xff]  }
 0x176   :  { %2011 = vmatprep.subr.bf16.mxu0 %v2768_v23  ;;  %2097 = vmatprep.subr.bf16.mxu1 %v2771_v24  ;;  %v2859_v23 = vld [vmem:[#allocation7 + $0x3e8] ss:$16 sps:$4 sm:$0xff]  }
 0x178   :  { %2001 = vmatmul.mubr.bf16.vlgmr.msra.gmra.mrb[0].mxu0 %v3650_v22  ;;  %2087 = vmatmul.mubr.bf16.vlgmr.msra.gmra.mrb[0].mxu1 %v3650_v22  ;;  %v2789_v22 = vld [vmem:[#allocation7 + $0x26c] ss:$16 sps:$4 sm:$0xff]  }
 0x179   :  { %2012 = vmatpush1.bf16.msra.mxu0 %v2766_v16  ;;  %2098 = vmatpush1.bf16.msra.mxu1 %v2769_v58 }
 0x17a   :  { %2013 = vmatprep.subr.bf16.mxu0 %v2774_v61  ;;  %2099 = vmatprep.subr.bf16.mxu1 %v2777_v56 }
 0x17b   :  { %2043 = vmatprep.mubr.bf16.mxu0 %v3655_v27  ;;  %2129 = vmatprep.mubr.bf16.mxu1 %v3655_v27  ;;  %v2793_v27 = vld [vmem:[#allocation7 + $0x288] ss:$16 sps:$4 sm:$0xff]  }
 0x17d   :  { %2014 = vmatpush1.bf16.msra.mxu0 %v2772_v2  ;;  %2100 = vmatpush1.bf16.msra.mxu1 %v2775_v26 }
 0x17e   :  { %2015 = vmatprep.subr.bf16.mxu0 %v2780_v28  ;;  %2101 = vmatprep.subr.bf16.mxu1 %v2783_v29 }
 0x181   :  { %2016 = vmatpush1.bf16.msra.mxu0 %v2778_v30  ;;  %2102 = vmatpush1.bf16.msra.mxu1 %v2781_v31 }
 0x182   :  { %2017 = vmatprep.subr.bf16.mxu0 %v2786_v32  ;;  %2103 = vmatprep.subr.bf16.mxu1 %v2789_v22 }
 0x185   :  { %2018 = vmatpush1.bf16.msra.mxu0 %v2784_v33  ;;  %2104 = vmatpush1.bf16.msra.mxu1 %v2787_v34 }
 0x186   :  { %2019 = vmatprep.subr.bf16.mxu0 %v2792_v35  ;;  %2105 = vmatprep.subr.bf16.mxu1 %v2795_v36 }
 0x189   :  { %2020 = vmatpush1.bf16.msra.mxu0 %v2790_v37  ;;  %2106 = vmatpush1.bf16.msra.mxu1 %v2793_v27 }
 0x18a   :  { %2021 = vmatprep.subr.bf16.mxu0 %v2798_v38  ;;  %2107 = vmatprep.subr.bf16.mxu1 %v2801_v39 }
 0x18d   :  { %2022 = vmatpush1.bf16.msra.mxu0 %v2796_v40  ;;  %2108 = vmatpush1.bf16.msra.mxu1 %v2799_v41 }
 0x18e   :  { %2023 = vmatprep.subr.bf16.mxu0 %v2804_v42  ;;  %2109 = vmatprep.subr.bf16.mxu1 %v2807_v43 }
 0x191   :  { %2024 = vmatpush1.bf16.msra.mxu0 %v2802_v44  ;;  %2110 = vmatpush1.bf16.msra.mxu1 %v2805_v45 }
 0x192   :  { %2025 = vmatprep.subr.bf16.mxu0 %v2810_v48  ;;  %2111 = vmatprep.subr.bf16.mxu1 %v2813_v49 }
 0x195   :  { %2026 = vmatpush1.bf16.msra.mxu0 %v2808_v50  ;;  %2112 = vmatpush1.bf16.msra.mxu1 %v2811_v51 }
 0x196   :  { %2027 = vmatprep.subr.bf16.mxu0 %v2816_v52  ;;  %2113 = vmatprep.subr.bf16.mxu1 %v2819_v53 }
 0x199   :  { %2028 = vmatpush1.bf16.msra.mxu0 %v2814_v54  ;;  %2114 = vmatpush1.bf16.msra.mxu1 %v2817_v57 }
 0x19a   :  { %2029 = vmatprep.subr.bf16.mxu0 %v2822_v62  ;;  %2115 = vmatprep.subr.bf16.mxu1 %v2825_v0 }
 0x19d   :  { %2030 = vmatpush1.bf16.msra.mxu0 %v2820_v1  ;;  %2116 = vmatpush1.bf16.msra.mxu1 %v2823_v3 }
 0x19e   :  { %2031 = vmatprep.subr.bf16.mxu0 %v2828_v4  ;;  %2117 = vmatprep.subr.bf16.mxu1 %v2831_v5 }
 0x1a1   :  { %2032 = vmatpush1.bf16.msra.mxu0 %v2826_v6  ;;  %2118 = vmatpush1.bf16.msra.mxu1 %v2829_v9 }
 0x1a2   :  { %2033 = vmatprep.subr.bf16.mxu0 %v2834_v10  ;;  %2119 = vmatprep.subr.bf16.mxu1 %v2837_v11 }
 0x1a5   :  { %2034 = vmatpush1.bf16.msra.mxu0 %v2832_v12  ;;  %2120 = vmatpush1.bf16.msra.mxu1 %v2835_v15 }
 0x1a6   :  { %2035 = vmatprep.subr.bf16.mxu0 %v2840_v8  ;;  %2121 = vmatprep.subr.bf16.mxu1 %v2843_v13 }
 0x1a9   :  { %2036 = vmatpush1.bf16.msra.mxu0 %v2838_v14  ;;  %2122 = vmatpush1.bf16.msra.mxu1 %v2841_v60 }
 0x1aa   :  { %2037 = vmatprep.subr.bf16.mxu0 %v2846_v47  ;;  %2123 = vmatprep.subr.bf16.mxu1 %v2849_v55 }
 0x1ad   :  { %2038 = vmatpush1.bf16.msra.mxu0 %v2844_v20  ;;  %2124 = vmatpush1.bf16.msra.mxu1 %v2847_v59 }
 0x1ae   :  { %2039 = vmatprep.subr.bf16.mxu0 %v2852_v46  ;;  %2125 = vmatprep.subr.bf16.mxu1 %v2855_v7 }
 0x1b1   :  { %2040 = vmatpush1.bf16.msra.mxu0 %v2850_v63  ;;  %2126 = vmatpush1.bf16.msra.mxu1 %v2853_v19 }
 0x1b2   :  { %2041 = vmatprep.subr.bf16.mxu0 %v2858_v21  ;;  %2127 = vmatprep.subr.bf16.mxu1 %v2861_v17 }
 0x1b5   :  { %2042 = vmatpush1.bf16.msra.mxu0 %v2856_v18  ;;  %2128 = vmatpush1.bf16.msra.mxu1 %v2859_v23 }
 0x1b8   :  { %2044 = vmatmul.mubr.bf16.vlgmr.msra.gmra.mrb[0].mxu0 %v3705_v25  ;;  %2130 = vmatmul.mubr.bf16.vlgmr.msra.gmra.mrb[0].mxu1 %v3705_v25 }
 0x28b   :  { %v2045_v24 = vpop.f32.mrb[0].mxu0  ;;  %v2131_v16 = vpop.f32.mrb[0].mxu1 }
 0x28c   :  { %2148 = vst [vmem:[#allocation8] sm:$0xff] %v2045_v24  ;;  %2150 = vst [vmem:[#allocation8 + $0x10] sm:$0xff] %v2131_v16  ;;  %v2047_v58 = vpop.f32.mrb[1].mxu0  ;;  %v2133_v61 = vpop.f32.mrb[1].mxu1 }
 0x28d   :  { %2149 = vst [vmem:[#allocation8 + $0x8] sm:$0xff] %v2047_v58  ;;  %2151 = vst [vmem:[#allocation8 + $0x18] sm:$0xff] %v2133_v61  ;;  %v2049_v56 = vpop.f32.mrb[2].mxu0  ;;  %v2135_v2 = vpop.f32.mrb[2].mxu1 }
 0x28e   :  { %2152 = vst [vmem:[#allocation8 + $0x20] sm:$0xff] %v2049_v56  ;;  %2154 = vst [vmem:[#allocation8 + $0x30] sm:$0xff] %v2135_v2  ;;  %v2051_v26 = vpop.f32.mrb[3].mxu0  ;;  %v2137_v28 = vpop.f32.mrb[3].mxu1 }
 0x28f   :  { %2153 = vst [vmem:[#allocation8 + $0x28] sm:$0xff] %v2051_v26  ;;  %2155 = vst [vmem:[#allocation8 + $0x38] sm:$0xff] %v2137_v28 }
 0x290   :  { %2960 = shalt.err (!%p2957_p0)
}
 0x291   :  { %s2961_s27 = scalar_lea.hbm %s3528_s3, 1024 }
 0x292   :  { %p2962_p1 = scmp.ne.s32.totalorder %s3528_s3, %s2961_s27  ;;  %p2965_p2 = scmp.lt.u32.totalorder %s2961_s27, %s3528_s3 }
 0x294   :  { %p2967_p3 = pnand %p2965_p2, %p2962_p1 }
 0x296   :  { %2970 = shalt.err (!%p2967_p3)
}
 0x297   :  { %2167 = dma.vmem_to_hbm [thread:$0]  %s2162_s22, 1024, %s3528_s3, [#allocation4], %s2981_s1, %s2981_s1, %s2982_s9  }
 0x298   :  { %2975 = dma.done.wait [#allocation4], 1024  }
 0x299   :  { %2976 = vsyncadd [#allocation4], 4294966272 }
 0x29a   :  { %2171 = vsyncpa [#allocation3], 1 }
 0x29b   :  { %2172 = vsyncpa [#allocation6], 1 }
 0x29c   :  { %2173 = vsyncpa [#allocation4], 1 }

</bundles_post_ra>
